<compile_context>
chip_gen: v6e
topology: v6e:2x2x1
jax: 0.10.0
libtpu: 0.0.40
codegen_flags: <defaults>
</compile_context>

<pallas_src>
import functools

import jax
import jax.numpy as jnp
from jax.experimental import pallas as pl
from jax.experimental.pallas import tpu as pltpu

N_SEQ = 100          # LinearEncoder in_len
D_MODEL = 256        # IsoFFN dim
EXPANSION = 4
D_HIDDEN = D_MODEL * EXPANSION
LN_EPS = 1e-5
N_HIDDEN_CHUNKS = 4  # bounds the live (rows, hidden) intermediate in VMEM


def _adapter_kernel(x_ref, w1_ref, b1_ref, w2_ref, wsel_ref, c_ref, out_ref,
                    *, bf16_elementwise):
    """BM images per grid step, flattened to (BM*N_SEQ, D) rows.

        out = Wsel@x + (Wsel@GELU(LN(x)@W1' + b1'))@W2 + c
    with W1'/b1' carrying the LayerNorm affine, c = sum(wlen)*b2 + blen, and
    Wsel = kron(I_BM, wlen) so both sequence reductions run on the (idle) MXU.
    """
    elt = jnp.bfloat16 if bf16_elementwise else jnp.float32

    x2 = x_ref[...].astype(jnp.float32)                    # (rows, D)
    rows, d = x2.shape
    d_hidden = w1_ref.shape[1]
    chunk = d_hidden // N_HIDDEN_CHUNKS

    # Two-pass LayerNorm statistics (centered variance, f32); affine is folded
    # into W1/b1 on the host so only normalization happens here.
    mu = jnp.mean(x2, axis=-1, keepdims=True)
    xc = x2 - mu
    var = jnp.mean(xc * xc, axis=-1, keepdims=True)
    xn_b = (xc * jax.lax.rsqrt(var + LN_EPS)).astype(jnp.bfloat16)

    wsel = wsel_ref[...]                                    # (BM, rows) f32
    wsel_e = wsel.astype(elt)
    bm = wsel.shape[0]

    # Residual term: per-image wlen-weighted sum of raw x (small f32 matmul).
    r = jnp.dot(wsel, x2, preferred_element_type=jnp.float32)      # (BM, D)

    def chunk_body(ci, acc):
        off = pl.multiple_of(ci * chunk, chunk)
        w1c = w1_ref[:, pl.ds(off, chunk)]                  # (D, chunk) bf16
        b1c = b1_ref[:, pl.ds(off, chunk)]                  # (1, chunk) f32
        h = jnp.dot(xn_b, w1c, preferred_element_type=jnp.float32) + b1c
        # tanh GELU -> EUP; packed bf16 on v6e/v7x halves the VALU work.
        h = jax.nn.gelu(h.astype(elt), approximate=True)    # (rows, chunk)
        s = jnp.dot(wsel_e, h, preferred_element_type=jnp.float32)  # (BM, chunk)
        w2c = w2_ref[pl.ds(off, chunk), :]                  # (chunk, D) bf16
        return acc + jnp.dot(s.astype(jnp.bfloat16), w2c,
                             preferred_element_type=jnp.float32)

    acc = jax.lax.fori_loop(0, N_HIDDEN_CHUNKS, chunk_body,
                            jnp.zeros((bm, d), jnp.float32))

    out_ref[...] = (r + acc + c_ref[...]).astype(out_ref.dtype)


def _tpu_generation():
    try:
        kind = jax.devices()[0].device_kind.lower()
    except Exception:
        return None
    for g in ("v2", "v3", "v4", "v5", "v6", "v7"):
        if g in kind:
            return g
    return None


def _choose_block_batch(batch, bm_cap):
    # The flattened (BM*100, 256) x block and the (BM, 256) output block need a
    # sublane dim that is a multiple of 8 unless the block spans the full
    # array; so BM is either the whole batch (single grid step, zero padding)
    # or a multiple of 8 that divides the batch (grid >= 2 when possible).
    if batch <= 8 or batch % 8 != 0:
        return batch
    half = batch // 2
    bm = min(bm_cap, max(8, half - half % 8))
    while batch % bm:
        bm -= 8
    return max(bm, 8)


def linear_encoder_pallas(x, params):
    """Pallas implementation of LinearEncoder.forward (eval mode).

    x: (B, 100, 256) f32 (or (100, 256), auto-unsqueezed; or (B, C, H, W),
       flattened + permuted like the torch module).  Returns (B, 1, 256) f32.
    """
    if x.ndim == 4:
        b, c, h, w = x.shape
        x = x.reshape(b, c, h * w).transpose(0, 2, 1)       # (B, H*W, C)
    if x.ndim == 2:
        x = x[None]
    B, N, D = x.shape
    assert N == N_SEQ and D == D_MODEL, (N, D)

    gamma, beta, w1, b1, w2, b2, wlen, blen = params
    gamma = jnp.asarray(gamma, jnp.float32).reshape(1, D)
    beta = jnp.asarray(beta, jnp.float32).reshape(1, D)
    w1 = jnp.asarray(w1, jnp.float32).reshape(D, D_HIDDEN)
    b1 = jnp.asarray(b1, jnp.float32).reshape(1, D_HIDDEN)
    w2 = jnp.asarray(w2, jnp.float32).reshape(D_HIDDEN, D)
    b2 = jnp.asarray(b2, jnp.float32).reshape(1, D)
    wlen = jnp.asarray(wlen, jnp.float32).reshape(1, N)
    blen = jnp.asarray(blen, jnp.float32).reshape(1, 1)

    # One-time host-side operand prep (a real model would store these forms).
    w1_bf = (gamma.reshape(D, 1) * w1).astype(jnp.bfloat16)   # LN gamma folded
    b1_f = beta @ w1 + b1                                     # LN beta folded
    w2_bf = w2.astype(jnp.bfloat16)
    c = jnp.sum(wlen) * b2 + blen                             # folded lin_len bias

    gen = _tpu_generation()
    bf16_elt = gen not in ("v2", "v3", "v4", "v5")            # no bf16 VPU there
    bm_cap = {"v2": 8, "v3": 8, "v4": 8, "v5": 8, "v6": 32}.get(gen, 16)
    BM = _choose_block_batch(B, bm_cap)
    n_blocks = B // BM

    wsel = jnp.kron(jnp.eye(BM, dtype=jnp.float32), wlen)     # (BM, BM*N)
    x2 = jnp.asarray(x, jnp.float32).reshape(B * N, D)        # free reshape

    kernel = functools.partial(_adapter_kernel, bf16_elementwise=bf16_elt)
    const = lambda b: (0, 0)
    out = pl.pallas_call(
        kernel,
        out_shape=jax.ShapeDtypeStruct((B, D), jnp.float32),
        grid_spec=pltpu.PrefetchScalarGridSpec(
            num_scalar_prefetch=0,
            grid=(n_blocks,),
            in_specs=[
                pl.BlockSpec((BM * N, D), lambda b: (b, 0)),     # x rows (streamed)
                pl.BlockSpec((D, D_HIDDEN), const),              # W1 (bf16, LN folded)
                pl.BlockSpec((1, D_HIDDEN), const),              # b1 (f32, LN folded)
                pl.BlockSpec((D_HIDDEN, D), const),              # W2 (bf16)
                pl.BlockSpec((BM, BM * N), const),               # Wsel = kron(I, wlen)
                pl.BlockSpec((1, D), const),                     # c = sum(wlen)*b2+blen
            ],
            out_specs=pl.BlockSpec((BM, D), lambda b: (b, 0)),
        ),
        compiler_params=pltpu.CompilerParams(
            dimension_semantics=("parallel",),
            vmem_limit_bytes=(96 * 1024 * 1024 if gen == "v6" else None),
        ),
    )(x2, w1_bf, b1_f, w2_bf, wsel, c)
    return out.reshape(B, 1, D)


def _xavier_uniform(key, shape, gain=2.0):
    # matches nn.init.xavier_uniform_(w, gain=2) used in init_weights()
    fan_in, fan_out = shape[0], shape[1]
    limit = gain * jnp.sqrt(6.0 / (fan_in + fan_out))
    return jax.random.uniform(key, shape, jnp.float32, -limit, limit)


def init_params(key):
    k = jax.random.split(key, 8)
    gamma = 1.0 + 0.1 * jax.random.normal(k[0], (D_MODEL,), jnp.float32)
    beta = 0.1 * jax.random.normal(k[1], (D_MODEL,), jnp.float32)
    w1 = _xavier_uniform(k[2], (D_MODEL, D_HIDDEN))
    b1 = 0.05 * jax.random.normal(k[3], (D_HIDDEN,), jnp.float32)
    w2 = _xavier_uniform(k[4], (D_HIDDEN, D_MODEL))
    b2 = 0.05 * jax.random.normal(k[5], (D_MODEL,), jnp.float32)
    wlen = _xavier_uniform(k[6], (1, N_SEQ))                  # lin_len weight
    blen = 0.05 * jax.random.normal(k[7], (1,), jnp.float32)  # lin_len bias
    return (gamma, beta, w1, b1, w2, b2, wlen, blen)


def linear_encoder_ref(x, params):
    """Pure-JAX f32 reference of the original (un-folded) forward math."""
    gamma, beta, w1, b1, w2, b2, wlen, blen = params
    gamma = jnp.reshape(gamma, (-1,))
    beta = jnp.reshape(beta, (-1,))
    b1 = jnp.reshape(b1, (-1,))
    b2 = jnp.reshape(b2, (-1,))
    wlen = jnp.reshape(wlen, (1, -1))
    blen = jnp.reshape(blen, ())
    mu = jnp.mean(x, axis=-1, keepdims=True)
    var = jnp.mean((x - mu) ** 2, axis=-1, keepdims=True)
    xn = (x - mu) / jnp.sqrt(var + LN_EPS) * gamma + beta
    h = jax.nn.gelu(xn @ w1 + b1, approximate=False)          # torch nn.GELU default
    y = x + h @ w2 + b2
    return jnp.einsum("on,bnd->bod", wlen, y) + blen


if __name__ == "__main__":
    key = jax.random.PRNGKey(0)
    kp, kx = jax.random.split(key)
    params = init_params(kp)

    # synthetic detector embeddings: B=2 images, 100 query embeddings of dim 256
    B = 2
    x = jax.random.normal(kx, (B, N_SEQ, D_MODEL), jnp.float32)

    out = jax.block_until_ready(linear_encoder_pallas(x, params))
    assert out.shape == (B, 1, D_MODEL), out.shape

    ref = linear_encoder_ref(x, params)
    # bf16 MXU operands, tanh GELU and the algebraic folds change rounding /
    # summation order; check max error relative to the output scale.
    rel_err = float(jnp.max(jnp.abs(out - ref)) / (jnp.max(jnp.abs(ref)) + 1e-6))
    assert rel_err < 2e-2, rel_err

    print("KERNEL_OK")
</pallas_src>

<mosaic_0001>
module attributes {stable_mosaic.version = 11 : i64} {
  func.func @_adapter_kernel(%arg0: i32, %arg1: memref<200x256xf32, #tpu.memory_space<vmem>>, %arg2: memref<256x1024xbf16, #tpu.memory_space<vmem>>, %arg3: memref<1x1024xf32, #tpu.memory_space<vmem>>, %arg4: memref<1024x256xbf16, #tpu.memory_space<vmem>>, %arg5: memref<2x200xf32, #tpu.memory_space<vmem>>, %arg6: memref<1x256xf32, #tpu.memory_space<vmem>>, %arg7: memref<2x256xf32, #tpu.memory_space<vmem>>) attributes {dimension_semantics = [#tpu.dimension_semantics<parallel>], iteration_bounds = array<i64: 1>, scalar_prefetch = 0 : i64, scratch_operands = 0 : i64, tpu.core_type = #tpu.core_type<tc>, window_params = [{transform_indices = @transform_0, window_bounds = array<i64: 200, 256>}, {pipeline_mode = #tpu.pipeline_mode<synchronous>, transform_indices = @transform_1, window_bounds = array<i64: 256, 1024>}, {pipeline_mode = #tpu.pipeline_mode<synchronous>, transform_indices = @transform_2, window_bounds = array<i64: 1, 1024>}, {pipeline_mode = #tpu.pipeline_mode<synchronous>, transform_indices = @transform_3, window_bounds = array<i64: 1024, 256>}, {pipeline_mode = #tpu.pipeline_mode<synchronous>, transform_indices = @transform_4, window_bounds = array<i64: 2, 200>}, {pipeline_mode = #tpu.pipeline_mode<synchronous>, transform_indices = @transform_5, window_bounds = array<i64: 1, 256>}, {transform_indices = @transform_6, window_bounds = array<i64: 2, 256>}]} {
    %c0 = arith.constant 0 : index
    %c0_0 = arith.constant 0 : index
    %0 = vector.load %arg1[%c0, %c0_0] : memref<200x256xf32, #tpu.memory_space<vmem>>, vector<200x256xf32>
    %cst = arith.constant dense<0.000000e+00> : vector<200xf32>
    %1 = vector.multi_reduction <add>, %0, %cst [1] : vector<200x256xf32> to vector<200xf32>
    %2 = vector.shape_cast %1 : vector<200xf32> to vector<200x1xf32>
    %cst_1 = arith.constant 2.560000e+02 : f32
    %3 = vector.broadcast %cst_1 : f32 to vector<200x1xf32>
    %4 = arith.divf %2, %3 : vector<200x1xf32>
    %5 = vector.broadcast %4 : vector<200x1xf32> to vector<200x256xf32>
    %6 = arith.subf %0, %5 : vector<200x256xf32>
    %7 = arith.mulf %6, %6 : vector<200x256xf32>
    %cst_2 = arith.constant dense<0.000000e+00> : vector<200xf32>
    %8 = vector.multi_reduction <add>, %7, %cst_2 [1] : vector<200x256xf32> to vector<200xf32>
    %9 = vector.shape_cast %8 : vector<200xf32> to vector<200x1xf32>
    %cst_3 = arith.constant 2.560000e+02 : f32
    %10 = vector.broadcast %cst_3 : f32 to vector<200x1xf32>
    %11 = arith.divf %9, %10 : vector<200x1xf32>
    %cst_4 = arith.constant 9.99999974E-6 : f32
    %12 = vector.broadcast %cst_4 : f32 to vector<200x1xf32>
    %13 = arith.addf %11, %12 : vector<200x1xf32>
    %14 = math.rsqrt %13 : vector<200x1xf32>
    %15 = vector.broadcast %14 : vector<200x1xf32> to vector<200x256xf32>
    %16 = arith.mulf %6, %15 : vector<200x256xf32>
    %17 = arith.truncf %16 : vector<200x256xf32> to vector<200x256xbf16>
    %c0_5 = arith.constant 0 : index
    %c0_6 = arith.constant 0 : index
    %18 = vector.load %arg5[%c0_5, %c0_6] : memref<2x200xf32, #tpu.memory_space<vmem>>, vector<2x200xf32>
    %19 = arith.truncf %18 : vector<2x200xf32> to vector<2x200xbf16>
    %cst_7 = arith.constant dense<0.000000e+00> : vector<2x256xf32>
    %20 = tpu.matmul %18, %0, %cst_7 {dimension_numbers = #tpu.dot_dimension_numbers<[1], [0], [0], [1], [0, 0, 1, 1], [], []>} : vector<2x200xf32>, vector<200x256xf32>, vector<2x256xf32> -> vector<2x256xf32>
    %cst_8 = arith.constant 0.000000e+00 : f32
    %21 = vector.broadcast %cst_8 : f32 to vector<2x256xf32>
    %c0_i32 = arith.constant 0 : i32
    %c4_i32 = arith.constant 4 : i32
    %22 = arith.addi %c0_i32, %c4_i32 : i32
    %c1_i32 = arith.constant 1 : i32
    %23 = scf.for %arg8 = %c0_i32 to %22 step %c1_i32 iter_args(%arg9 = %21) -> (vector<2x256xf32>)  : i32 {
      %c256_i32 = arith.constant 256 : i32
      %29 = arith.muli %arg8, %c256_i32 : i32
      %30 = tpu.assume_multiple %29, 256 : i32
      %c0_14 = arith.constant 0 : index
      %31 = arith.index_cast %30 : i32 to index
      %32 = vector.load %arg2[%c0_14, %31] : memref<256x1024xbf16, #tpu.memory_space<vmem>>, vector<256x256xbf16>
      %c0_15 = arith.constant 0 : index
      %33 = arith.index_cast %30 : i32 to index
      %34 = vector.load %arg3[%c0_15, %33] : memref<1x1024xf32, #tpu.memory_space<vmem>>, vector<1x256xf32>
      %cst_16 = arith.constant dense<0.000000e+00> : vector<200x256xf32>
      %35 = tpu.matmul %17, %32, %cst_16 {dimension_numbers = #tpu.dot_dimension_numbers<[1], [0], [0], [1], [0, 0, 1, 1], [], []>} : vector<200x256xbf16>, vector<256x256xbf16>, vector<200x256xf32> -> vector<200x256xf32>
      %36 = vector.broadcast %34 : vector<1x256xf32> to vector<200x256xf32>
      %37 = arith.addf %35, %36 : vector<200x256xf32>
      %38 = arith.truncf %37 : vector<200x256xf32> to vector<200x256xbf16>
      %39 = arith.mulf %38, %38 : vector<200x256xbf16>
      %40 = arith.mulf %38, %39 : vector<200x256xbf16>
      %cst_17 = arith.constant 4.467770e-02 : bf16
      %41 = vector.broadcast %cst_17 : bf16 to vector<200x256xbf16>
      %42 = arith.mulf %41, %40 : vector<200x256xbf16>
      %43 = arith.addf %38, %42 : vector<200x256xbf16>
      %cst_18 = arith.constant 7.968750e-01 : bf16
      %44 = vector.broadcast %cst_18 : bf16 to vector<200x256xbf16>
      %45 = arith.mulf %44, %43 : vector<200x256xbf16>
      %46 = math.tanh %45 : vector<200x256xbf16>
      %cst_19 = arith.constant 1.000000e+00 : bf16
      %47 = vector.broadcast %cst_19 : bf16 to vector<200x256xbf16>
      %48 = arith.addf %47, %46 : vector<200x256xbf16>
      %cst_20 = arith.constant 5.000000e-01 : bf16
      %49 = vector.broadcast %cst_20 : bf16 to vector<200x256xbf16>
      %50 = arith.mulf %49, %48 : vector<200x256xbf16>
      %51 = arith.mulf %38, %50 : vector<200x256xbf16>
      %cst_21 = arith.constant dense<0.000000e+00> : vector<2x256xf32>
      %52 = tpu.matmul %19, %51, %cst_21 {dimension_numbers = #tpu.dot_dimension_numbers<[1], [0], [0], [1], [0, 0, 1, 1], [], []>} : vector<2x200xbf16>, vector<200x256xbf16>, vector<2x256xf32> -> vector<2x256xf32>
      %53 = arith.index_cast %30 : i32 to index
      %c0_22 = arith.constant 0 : index
      %54 = vector.load %arg4[%53, %c0_22] : memref<1024x256xbf16, #tpu.memory_space<vmem>>, vector<256x256xbf16>
      %55 = arith.truncf %52 : vector<2x256xf32> to vector<2x256xbf16>
      %cst_23 = arith.constant dense<0.000000e+00> : vector<2x256xf32>
      %56 = tpu.matmul %55, %54, %cst_23 {dimension_numbers = #tpu.dot_dimension_numbers<[1], [0], [0], [1], [0, 0, 1, 1], [], []>} : vector<2x256xbf16>, vector<256x256xbf16>, vector<2x256xf32> -> vector<2x256xf32>
      %57 = arith.addf %arg9, %56 : vector<2x256xf32>
      scf.yield %57 : vector<2x256xf32>
    }
    %c4_i32_9 = arith.constant 4 : i32
    %24 = arith.addf %20, %23 : vector<2x256xf32>
    %c0_10 = arith.constant 0 : index
    %c0_11 = arith.constant 0 : index
    %25 = vector.load %arg6[%c0_10, %c0_11] : memref<1x256xf32, #tpu.memory_space<vmem>>, vector<1x256xf32>
    %26 = vector.broadcast %25 : vector<1x256xf32> to vector<2x256xf32>
    %27 = arith.addf %24, %26 : vector<2x256xf32>
    %c0_12 = arith.constant 0 : index
    %c0_13 = arith.constant 0 : index
    %28 = vector.load %arg7[%c0_12, %c0_13] : memref<2x256xf32, #tpu.memory_space<vmem>>, vector<2x256xf32>
    tpu.vector_store %arg7[%c0_12, %c0_13], %27 {strides = array<i32>} : memref<2x256xf32, #tpu.memory_space<vmem>>, vector<2x256xf32>,
    return
  }
  func.func @transform_0(%arg0: i32) -> (i32, i32) {
    %c0_i32 = arith.constant 0 : i32
    %c0_i32_0 = arith.constant 0 : i32
    return %arg0, %c0_i32 : i32, i32
  }
  func.func @transform_1(%arg0: i32) -> (i32, i32) {
    %c0_i32 = arith.constant 0 : i32
    %c0_i32_0 = arith.constant 0 : i32
    %c0_i32_1 = arith.constant 0 : i32
    return %c0_i32, %c0_i32_0 : i32, i32
  }
  func.func @transform_2(%arg0: i32) -> (i32, i32) {
    %c0_i32 = arith.constant 0 : i32
    %c0_i32_0 = arith.constant 0 : i32
    %c0_i32_1 = arith.constant 0 : i32
    return %c0_i32, %c0_i32_0 : i32, i32
  }
  func.func @transform_3(%arg0: i32) -> (i32, i32) {
    %c0_i32 = arith.constant 0 : i32
    %c0_i32_0 = arith.constant 0 : i32
    %c0_i32_1 = arith.constant 0 : i32
    return %c0_i32, %c0_i32_0 : i32, i32
  }
  func.func @transform_4(%arg0: i32) -> (i32, i32) {
    %c0_i32 = arith.constant 0 : i32
    %c0_i32_0 = arith.constant 0 : i32
    %c0_i32_1 = arith.constant 0 : i32
    return %c0_i32, %c0_i32_0 : i32, i32
  }
  func.func @transform_5(%arg0: i32) -> (i32, i32) {
    %c0_i32 = arith.constant 0 : i32
    %c0_i32_0 = arith.constant 0 : i32
    %c0_i32_1 = arith.constant 0 : i32
    return %c0_i32, %c0_i32_0 : i32, i32
  }
  func.func @transform_6(%arg0: i32) -> (i32, i32) {
    %c0_i32 = arith.constant 0 : i32
    %c0_i32_0 = arith.constant 0 : i32
    return %arg0, %c0_i32 : i32, i32
  }
}

</mosaic_0001>

<bundles_post_ra>
// kernel: tpu_custom_call.1
= control target key start
LH: loop header
LB: loop body
LE: loop exit
PB: predicated region body
PF: predicated region fallthrough
CT: control target
= control target key end

     0   :  { %11 = vsyncpa [#allocation3], 0  ;;  %s3247_s0 = inlined_call_operand.hbm [shape: f32[200,256], index: 0, kind: input, shape index: {}]   ;;  %s3248_s1 = inlined_call_operand.hbm [shape: bf16[256,1024], index: 1, kind: input, shape index: {}]   ;;  %s3249_s2 = inlined_call_operand.hbm [shape: f32[1,1024], index: 2, kind: input, shape index: {}]   ;;  %s3250_s3 = inlined_call_operand.hbm [shape: bf16[1024,256], index: 3, kind: input, shape index: {}]   ;;  %s3251_s4 = inlined_call_operand.vmem [shape: f32[2,200], index: 4, kind: input, shape index: {}]   ;;  %s3252_s5 = inlined_call_operand.vmem [shape: f32[1,256], index: 5, kind: input, shape index: {}]   ;;  %s3253_s6 = inlined_call_operand.hbm [shape: f32[2,256], index: 6, kind: output, shape index: {}]  }
   0x1   :  { %12 = vsyncpa [#allocation6], 0 }
   0x2   :  { %13 = vsyncpa [#allocation9], 0 }
   0x3   :  { %14 = vsyncpa [#allocation4], 0  ;;  %s2030_s21 = smov [#allocation5]  }
   0x4   :  { %s32_s22 = sshll.u32 %s2030_s21, 4  ;;  %s33_s22 = int_to_ptr.vmem [resolvable:$true] %s32_s22 }
   0x5   :  { %s1906_s23 = scalar_lea.vmem %s33_s22, 16384  ;;  %p1911_p1 = scmp.lt.s32.totalorder %s33_s22, %s33_s22 }
   0x6   :  { %p1907_p0 = scmp.ne.s32.totalorder %s33_s22, %s1906_s23  ;;  %p1912_p2 = scmp.lt.s32.totalorder %s1906_s23, %s1906_s23 }
   0x8   :  { %p1913_p3 = por %p1912_p2, %p1911_p1 }
   0xa   :  { %p1914_p4 = pnand %p1913_p3, %p1907_p0 }
   0xc   :  { %1917 = shalt.err (!%p1914_p4)
}
   0xd   :  { %s2031_s24 = smov 512   ;;  %s2032_s25 = smov 32  }
   0xe   :  { %38 = dma.hbm_to_vmem [thread:$0]  %s3248_s1, 16384, %s33_s22, [#allocation6], %s2031_s24, %s2031_s24, %s2032_s25  }
   0xf   :  { %s2033_s28 = smov [#allocation2]  }
  0x10   :  { %s20_s29 = sshll.u32 %s2033_s28, 4  ;;  %s21_s29 = int_to_ptr.vmem [resolvable:$true] %s20_s29 }
  0x11   :  { %s1926_s30 = scalar_lea.vmem %s21_s29, 6400  ;;  %p1931_p6 = scmp.lt.s32.totalorder %s21_s29, %s21_s29 }
  0x12   :  { %p1927_p5 = scmp.ne.s32.totalorder %s21_s29, %s1926_s30  ;;  %p1932_p7 = scmp.lt.s32.totalorder %s1926_s30, %s1926_s30 }
  0x14   :  { %p1933_p8 = por %p1932_p7, %p1931_p6 }
  0x16   :  { %p1934_p9 = pnand %p1933_p8, %p1927_p5 }
  0x18   :  { %1937 = shalt.err (!%p1934_p9)
}
  0x19   :  { %s2034_s7 = smov 256   ;;  %s2035_s8 = smov 16  }
  0x1a   :  { %26 = dma.hbm_to_vmem [thread:$0]  %s3247_s0, 6400, %s21_s29, [#allocation3], %s2034_s7, %s2034_s7, %s2035_s8  }
  0x1b   :  { %s2036_s11 = smov [#allocation7]   ;;  %s2037_s13 = smov [#allocation8]  }
  0x1c   :  { %s45_s12 = sshll.u32 %s2036_s11, 4  ;;  %s54_s1 = sshll.u32 %s2037_s13, 4  ;;  %s46_s12 = int_to_ptr.vmem [resolvable:$true] %s45_s12  ;;  %s55_s1 = int_to_ptr.vmem [resolvable:$true] %s54_s1 }
  0x1d   :  { %s1946_s14 = scalar_lea.vmem %s46_s12, 128  ;;  %p1951_p11 = scmp.lt.s32.totalorder %s46_s12, %s46_s12 }
  0x1e   :  { %p1947_p10 = scmp.ne.s32.totalorder %s46_s12, %s1946_s14  ;;  %p1952_p12 = scmp.lt.s32.totalorder %s1946_s14, %s1946_s14 }
  0x20   :  { %p1953_p13 = por %p1952_p12, %p1951_p11 }
  0x22   :  { %p1954_p0 = pnand %p1953_p13, %p1947_p10 }
  0x24   :  { %1957 = shalt.err (!%p1954_p0)
}
  0x25   :  { %48 = dma.hbm_to_vmem [thread:$0]  %s3249_s2, 128, %s46_s12, [#allocation6]  }
  0x26   :  { %s1966_s17 = scalar_lea.vmem %s55_s1, 16384  ;;  %p1971_p2 = scmp.lt.s32.totalorder %s55_s1, %s55_s1 }
  0x27   :  { %p1967_p1 = scmp.ne.s32.totalorder %s55_s1, %s1966_s17  ;;  %p1972_p3 = scmp.lt.s32.totalorder %s1966_s17, %s1966_s17 }
  0x29   :  { %p1973_p4 = por %p1972_p3, %p1971_p2 }
  0x2b   :  { %p1974_p5 = pnand %p1973_p4, %p1967_p1 }
  0x2d   :  { %1977 = shalt.err (!%p1974_p5)
}
  0x2e   :  { %s2038_s0 = smov 128   ;;  %s2039_s18 = smov 8  }
  0x2f   :  { %60 = dma.hbm_to_vmem [thread:$0]  %s3250_s3, 16384, %s55_s1, [#allocation9], %s2038_s0, %s2038_s0, %s2039_s18  }
  0x30   :  { %2010 = dma.done.wait [#allocation3], 6400  }
  0x31   :  { %2011 = vsyncadd [#allocation3], 4294960896 }
  0x32   :  { %2012 = dma.done.wait [#allocation6], 16512  }
  0x33   :  { %2013 = vsyncadd [#allocation6], 4294950784 }
  0x34   :  { %2014 = dma.done.wait [#allocation9], 16384  }
  0x35   :  { %2015 = vsyncadd [#allocation9], 4294950912  ;;  %v2091_v0 = vld.sshfl [vmem:[%s3251_s4] sm:$0x33 pattern:$0x76325410] }
  0x36   :  { %3363 = vst [vmem:[#allocation15_spill] sm:$0xff] %v2091_v0  ;;  %v2093_v1 = vld [vmem:[#allocation2] sm:$0xff]  ;;  %v2095_v2 = vld [vmem:[#allocation2 + $0x8] sm:$0xff]  ;;  %v2099_v3 = vcombine.high %v2091_v0, %v2091_v0  ;;  %v2109_v8 = vld [vmem:[#allocation2 + $0x10] sm:$0xff]  ;;  %s2707_s3 = smov 0  }
  0x37   :  { %3364 = vst [vmem:[#allocation16_spill] sm:$0xff] %v2093_v1  ;;  %3365 = vst [vmem:[#allocation17_spill] sm:$0xff] %v2095_v2  ;;  %v132_v5 = vadd.f32 %v2095_v2, %v2093_v1  ;;  %v2105_v6 = vld [vmem:[#allocation2 + $0x20] sm:$0xff]  ;;  %v2107_v7 = vld [vmem:[#allocation2 + $0x28] sm:$0xff] }
  0x38   :  { %3366 = vst [vmem:[#allocation18_spill] sm:$0xff] %v2099_v3  ;;  %3367 = vst [vmem:[#allocation19_spill] sm:$0xff] %v2105_v6  ;;  %v138_v9 = vadd.f32 %v2107_v7, %v2105_v6  ;;  %v2113_v10 = vld [vmem:[#allocation2 + $0x18] sm:$0xff]  ;;  %v2115_v11 = vld [vmem:[#allocation2 + $0x30] sm:$0xff] }
  0x39   :  { %3368 = vst [vmem:[#allocation20_spill] sm:$0xff] %v2107_v7  ;;  %3369 = vst [vmem:[#allocation21_spill] sm:$0xff] %v2109_v8  ;;  %v2117_v12 = vld [vmem:[#allocation2 + $0x38] sm:$0xff]  ;;  %133 = vadd.xlane.f32.xlu0 %v132_v5  ;;  %v135_v14 = vadd.f32 %v2113_v10, %v2109_v8  ;;  %v2125_v16 = vld [vmem:[#allocation2 + $0x40] sm:$0xff] }
  0x3a   :  { %3370 = vst [vmem:[#allocation22_spill] sm:$0xff] %v2113_v10  ;;  %3371 = vst [vmem:[#allocation23_spill] sm:$0xff] %v2115_v11  ;;  %139 = vadd.xlane.f32.xlu1 %v138_v9  ;;  %v141_v15 = vadd.f32 %v2117_v12, %v2115_v11  ;;  %v2127_v17 = vld [vmem:[#allocation2 + $0x48] sm:$0xff]  ;;  %v2129_v18 = vld [vmem:[#allocation2 + $0x50] sm:$0xff] }
  0x3b   :  { %3372 = vst [vmem:[#allocation24_spill] sm:$0xff] %v2117_v12  ;;  %3373 = vst [vmem:[#allocation25_spill] sm:$0xff] %v2125_v16  ;;  %v2131_v19 = vld [vmem:[#allocation2 + $0x58] sm:$0xff]  ;;  %v144_v20 = vadd.f32 %v2127_v17, %v2125_v16  ;;  %v2137_v22 = vld [vmem:[#allocation2 + $0x60] sm:$0xff] }
  0x3c   :  { %3374 = vst [vmem:[#allocation26_spill] sm:$0xff] %v2127_v17  ;;  %3375 = vst [vmem:[#allocation27_spill] sm:$0xff] %v2129_v18  ;;  %v147_v21 = vadd.f32 %v2131_v19, %v2129_v18  ;;  %v2139_v23 = vld [vmem:[#allocation2 + $0x68] sm:$0xff]  ;;  %v2141_v24 = vld [vmem:[#allocation2 + $0x70] sm:$0xff] }
  0x3d   :  { %3376 = vst [vmem:[#allocation28_spill] sm:$0xff] %v2131_v19  ;;  %136 = vadd.xlane.f32.xlu0 %v135_v14  ;;  %3377 = vst [vmem:[#allocation29_spill] sm:$0xff] %v2137_v22  ;;  %v2143_v25 = vld [vmem:[#allocation2 + $0x78] sm:$0xff]  ;;  %v150_v26 = vadd.f32 %v2139_v23, %v2137_v22  ;;  %v2149_v28 = vld [vmem:[#allocation2 + $0x80] sm:$0xff] }
  0x3e   :  { %142 = vadd.xlane.f32.xlu1 %v141_v15  ;;  %3378 = vst [vmem:[#allocation30_spill] sm:$0xff] %v2139_v23  ;;  %3379 = vst [vmem:[#allocation31_spill] sm:$0xff] %v2141_v24  ;;  %v153_v27 = vadd.f32 %v2143_v25, %v2141_v24  ;;  %v2151_v29 = vld [vmem:[#allocation2 + $0x88] sm:$0xff]  ;;  %v2153_v30 = vld [vmem:[#allocation2 + $0x90] sm:$0xff] }
  0x3f   :  { %3380 = vst [vmem:[#allocation32_spill] sm:$0xff] %v2143_v25  ;;  %3381 = vst [vmem:[#allocation33_spill] sm:$0xff] %v2149_v28  ;;  %v2155_v31 = vld [vmem:[#allocation2 + $0x98] sm:$0xff]  ;;  %v156_v32 = vadd.f32 %v2151_v29, %v2149_v28  ;;  %v2161_v34 = vld [vmem:[#allocation2 + $0xa0] sm:$0xff] }
  0x40   :  { %3382 = vst [vmem:[#allocation34_spill] sm:$0xff] %v2151_v29  ;;  %3383 = vst [vmem:[#allocation35_spill] sm:$0xff] %v2153_v30  ;;  %v159_v33 = vadd.f32 %v2155_v31, %v2153_v30  ;;  %v2163_v35 = vld [vmem:[#allocation2 + $0xa8] sm:$0xff]  ;;  %v2165_v36 = vld [vmem:[#allocation2 + $0xb0] sm:$0xff] }
  0x41   :  { %145 = vadd.xlane.f32.xlu0 %v144_v20  ;;  %3384 = vst [vmem:[#allocation36_spill] sm:$0xff] %v2155_v31  ;;  %3385 = vst [vmem:[#allocation37_spill] sm:$0xff] %v2161_v34  ;;  %v2167_v37 = vld [vmem:[#allocation2 + $0xb8] sm:$0xff]  ;;  %v162_v38 = vadd.f32 %v2163_v35, %v2161_v34  ;;  %v2173_v40 = vld [vmem:[#allocation2 + $0xc0] sm:$0xff] }
  0x42   :  { %148 = vadd.xlane.f32.xlu1 %v147_v21  ;;  %3386 = vst [vmem:[#allocation38_spill] sm:$0xff] %v2163_v35  ;;  %3387 = vst [vmem:[#allocation39_spill] sm:$0xff] %v2165_v36  ;;  %v165_v39 = vadd.f32 %v2167_v37, %v2165_v36  ;;  %v2175_v41 = vld [vmem:[#allocation2 + $0xc8] sm:$0xff]  ;;  %v2177_v42 = vld [vmem:[#allocation2 + $0xd0] sm:$0xff] }
  0x43   :  { %3388 = vst [vmem:[#allocation40_spill] sm:$0xff] %v2167_v37  ;;  %3389 = vst [vmem:[#allocation41_spill] sm:$0xff] %v2173_v40  ;;  %v2179_v43 = vld [vmem:[#allocation2 + $0xd8] sm:$0xff]  ;;  %v168_v44 = vadd.f32 %v2175_v41, %v2173_v40  ;;  %v2185_v46 = vld [vmem:[#allocation2 + $0xe0] sm:$0xff] }
  0x44   :  { %3390 = vst [vmem:[#allocation42_spill] sm:$0xff] %v2175_v41  ;;  %3391 = vst [vmem:[#allocation43_spill] sm:$0xff] %v2177_v42  ;;  %v171_v45 = vadd.f32 %v2179_v43, %v2177_v42  ;;  %v2187_v47 = vld [vmem:[#allocation2 + $0xe8] sm:$0xff]  ;;  %v2189_v48 = vld [vmem:[#allocation2 + $0xf0] sm:$0xff] }
  0x45   :  { %151 = vadd.xlane.f32.xlu0 %v150_v26  ;;  %3392 = vst [vmem:[#allocation44_spill] sm:$0xff] %v2179_v43  ;;  %3393 = vst [vmem:[#allocation45_spill] sm:$0xff] %v2185_v46  ;;  %v2191_v49 = vld [vmem:[#allocation2 + $0xf8] sm:$0xff]  ;;  %v174_v50 = vadd.f32 %v2187_v47, %v2185_v46  ;;  %v2197_v52 = vld [vmem:[#allocation2 + $0x100] sm:$0xff] }
  0x46   :  { %154 = vadd.xlane.f32.xlu1 %v153_v27  ;;  %3394 = vst [vmem:[#allocation46_spill] sm:$0xff] %v2187_v47  ;;  %3395 = vst [vmem:[#allocation47_spill] sm:$0xff] %v2189_v48  ;;  %v177_v51 = vadd.f32 %v2191_v49, %v2189_v48  ;;  %v2199_v53 = vld [vmem:[#allocation2 + $0x108] sm:$0xff]  ;;  %v2201_v54 = vld [vmem:[#allocation2 + $0x110] sm:$0xff] }
  0x47   :  { %3396 = vst [vmem:[#allocation48_spill] sm:$0xff] %v2191_v49  ;;  %3397 = vst [vmem:[#allocation49_spill] sm:$0xff] %v2197_v52  ;;  %v2203_v55 = vld [vmem:[#allocation2 + $0x118] sm:$0xff]  ;;  %v180_v56 = vadd.f32 %v2199_v53, %v2197_v52  ;;  %v2209_v58 = vld [vmem:[#allocation2 + $0x120] sm:$0xff] }
  0x48   :  { %3398 = vst [vmem:[#allocation50_spill] sm:$0xff] %v2199_v53  ;;  %3399 = vst [vmem:[#allocation51_spill] sm:$0xff] %v2201_v54  ;;  %v183_v57 = vadd.f32 %v2203_v55, %v2201_v54  ;;  %v2211_v59 = vld [vmem:[#allocation2 + $0x128] sm:$0xff]  ;;  %v2213_v60 = vld [vmem:[#allocation2 + $0x130] sm:$0xff] }
  0x49   :  { %157 = vadd.xlane.f32.xlu0 %v156_v32  ;;  %3400 = vst [vmem:[#allocation52_spill] sm:$0xff] %v2203_v55  ;;  %3401 = vst [vmem:[#allocation53_spill] sm:$0xff] %v2209_v58  ;;  %v2215_v61 = vld [vmem:[#allocation2 + $0x138] sm:$0xff]  ;;  %v186_v62 = vadd.f32 %v2211_v59, %v2209_v58  ;;  %v2221_v5 = vld [vmem:[#allocation2 + $0x140] sm:$0xff] }
  0x4a   :  { %160 = vadd.xlane.f32.xlu1 %v159_v33  ;;  %3402 = vst [vmem:[#allocation54_spill] sm:$0xff] %v2211_v59  ;;  %3403 = vst [vmem:[#allocation55_spill] sm:$0xff] %v2213_v60  ;;  %v189_v63 = vadd.f32 %v2215_v61, %v2213_v60  ;;  %v2223_v9 = vld [vmem:[#allocation2 + $0x148] sm:$0xff]  ;;  %v2225_v14 = vld [vmem:[#allocation2 + $0x150] sm:$0xff] }
  0x4b   :  { %3404 = vst [vmem:[#allocation56_spill] sm:$0xff] %v2215_v61  ;;  %3405 = vst [vmem:[#allocation57_spill] sm:$0xff] %v2221_v5  ;;  %v2227_v15 = vld [vmem:[#allocation2 + $0x158] sm:$0xff]  ;;  %v192_v20 = vadd.f32 %v2223_v9, %v2221_v5  ;;  %v2233_v26 = vld [vmem:[#allocation2 + $0x160] sm:$0xff] }
  0x4c   :  { %3406 = vst [vmem:[#allocation58_spill] sm:$0xff] %v2223_v9  ;;  %3407 = vst [vmem:[#allocation59_spill] sm:$0xff] %v2225_v14  ;;  %v195_v21 = vadd.f32 %v2227_v15, %v2225_v14  ;;  %v2235_v27 = vld [vmem:[#allocation2 + $0x168] sm:$0xff]  ;;  %v2237_v32 = vld [vmem:[#allocation2 + $0x170] sm:$0xff] }
  0x4d   :  { %163 = vadd.xlane.f32.xlu0 %v162_v38  ;;  %3408 = vst [vmem:[#allocation60_spill] sm:$0xff] %v2227_v15  ;;  %3409 = vst [vmem:[#allocation61_spill] sm:$0xff] %v2233_v26  ;;  %v2239_v33 = vld [vmem:[#allocation2 + $0x178] sm:$0xff]  ;;  %v198_v38 = vadd.f32 %v2235_v27, %v2233_v26 }
  0x4e   :  { %166 = vadd.xlane.f32.xlu1 %v165_v39  ;;  %3410 = vst [vmem:[#allocation62_spill] sm:$0xff] %v2235_v27  ;;  %3411 = vst [vmem:[#allocation63_spill] sm:$0xff] %v2237_v32  ;;  %v201_v39 = vadd.f32 %v2239_v33, %v2237_v32 }
  0x4f   :  { %3412 = vst [vmem:[#allocation64_spill] sm:$0xff] %v2239_v33 }
  0x51   :  { %169 = vadd.xlane.f32.xlu0 %v168_v44  ;;  %v2245_v44 = vld [vmem:[#allocation2 + $0x180] sm:$0xff] }
  0x52   :  { %172 = vadd.xlane.f32.xlu1 %v171_v45  ;;  %3413 = vst [vmem:[#allocation65_spill] sm:$0xff] %v2245_v44  ;;  %v2247_v45 = vld [vmem:[#allocation2 + $0x188] sm:$0xff] }
  0x53   :  { %3414 = vst [vmem:[#allocation66_spill] sm:$0xff] %v2247_v45 }
  0x55   :  { %175 = vadd.xlane.f32.xlu0 %v174_v50  ;;  %v204_v50 = vadd.f32 %v2247_v45, %v2245_v44 }
  0x56   :  { %178 = vadd.xlane.f32.xlu1 %v177_v51 }
  0x59   :  { %181 = vadd.xlane.f32.xlu0 %v180_v56 }
  0x5a   :  { %184 = vadd.xlane.f32.xlu1 %v183_v57 }
  0x5d   :  { %187 = vadd.xlane.f32.xlu0 %v186_v62 }
  0x5e   :  { %190 = vadd.xlane.f32.xlu1 %v189_v63 }
  0x61   :  { %193 = vadd.xlane.f32.xlu0 %v192_v20 }
  0x62   :  { %196 = vadd.xlane.f32.xlu1 %v195_v21 }
  0x65   :  { %199 = vadd.xlane.f32.xlu0 %v198_v38 }
  0x66   :  { %202 = vadd.xlane.f32.xlu1 %v201_v39 }
  0x69   :  { %205 = vadd.xlane.f32.xlu0 %v204_v50 }
  0xc2   :  { %v134_v51 = vpop.xlane.xlu0 %133 }
  0xc3   :  { %v208_v56 = vmul.f32 0.00390625, %v134_v51  ;;  %v140_v57 = vpop.xlane.xlu1 %139 }
  0xc4   :  { %v210_v62 = vmul.f32 0.00390625, %v140_v57 }
  0xc5   :  { %v2252_v63 = vsub.f32 %v2093_v1, %v208_v56  ;;  %v2255_v20 = vsub.f32 %v2095_v2, %v208_v56 }
  0xc6   :  { %v2258_v21 = vsub.f32 %v2105_v6, %v210_v62  ;;  %v2261_v38 = vsub.f32 %v2107_v7, %v210_v62  ;;  %v137_v4 = vpop.xlane.xlu0 %136 }
  0xc7   :  { %v209_v13 = vmul.f32 0.00390625, %v137_v4  ;;  %v143_v39 = vpop.xlane.xlu1 %142  ;;  %v283_v50 = vmul.f32 %v2252_v63, %v2252_v63  ;;  %v284_v51 = vmul.f32 %v2255_v20, %v2255_v20 }
  0xc8   :  { %3415 = vst [vmem:[#allocation67_spill] sm:$0xff] %v2258_v21  ;;  %3416 = vst [vmem:[#allocation68_spill] sm:$0xff] %v2261_v38  ;;  %v211_v57 = vmul.f32 0.00390625, %v143_v39  ;;  %v287_v56 = vmul.f32 %v2258_v21, %v2258_v21  ;;  %v288_v1 = vmul.f32 %v2261_v38, %v2261_v38 }
  0xc9   :  { %v2272_v2 = vsub.f32 %v2109_v8, %v209_v13  ;;  %v2275_v62 = vsub.f32 %v2113_v10, %v209_v13  ;;  %v333_v4 = vadd.f32 %v284_v51, %v283_v50 }
  0xca   :  { %v2278_v6 = vsub.f32 %v2115_v11, %v211_v57  ;;  %v2281_v7 = vsub.f32 %v2117_v12, %v211_v57  ;;  %v146_v39 = vpop.xlane.xlu0 %145  ;;  %v339_v21 = vadd.f32 %v288_v1, %v287_v56 }
  0xcb   :  { %v212_v0 = vmul.f32 0.00390625, %v146_v39  ;;  %334 = vadd.xlane.f32.xlu1 %v333_v4  ;;  %v149_v3 = vpop.xlane.xlu1 %148  ;;  %v285_v38 = vmul.f32 %v2272_v2, %v2272_v2  ;;  %v286_v8 = vmul.f32 %v2275_v62, %v2275_v62 }
  0xcc   :  { %v213_v13 = vmul.f32 0.00390625, %v149_v3  ;;  %v289_v50 = vmul.f32 %v2278_v6, %v2278_v6  ;;  %v290_v51 = vmul.f32 %v2281_v7, %v2281_v7 }
  0xcd   :  { %v2292_v57 = vsub.f32 %v2125_v16, %v212_v0  ;;  %v2295_v4 = vsub.f32 %v2127_v17, %v212_v0  ;;  %v336_v1 = vadd.f32 %v286_v8, %v285_v38 }
  0xce   :  { %v2298_v56 = vsub.f32 %v2129_v18, %v213_v13  ;;  %v2301_v39 = vsub.f32 %v2131_v19, %v213_v13  ;;  %v152_v3 = vpop.xlane.xlu0 %151  ;;  %v342_v12 = vadd.f32 %v290_v51, %v289_v50 }
  0xcf   :  { %v214_v10 = vmul.f32 0.00390625, %v152_v3  ;;  %340 = vadd.xlane.f32.xlu1 %v339_v21  ;;  %337 = vadd.xlane.f32.xlu0 %v336_v1  ;;  %v155_v11 = vpop.xlane.xlu1 %154  ;;  %v291_v16 = vmul.f32 %v2292_v57, %v2292_v57  ;;  %v292_v0 = vmul.f32 %v2295_v4, %v2295_v4 }
  0xd0   :  { %v215_v17 = vmul.f32 0.00390625, %v155_v11  ;;  %v293_v8 = vmul.f32 %v2298_v56, %v2298_v56  ;;  %v294_v38 = vmul.f32 %v2301_v39, %v2301_v39 }
  0xd1   :  { %v2312_v13 = vsub.f32 %v2137_v22, %v214_v10  ;;  %v2315_v21 = vsub.f32 %v2139_v23, %v214_v10  ;;  %v345_v50 = vadd.f32 %v292_v0, %v291_v16 }
  0xd2   :  { %v2318_v51 = vsub.f32 %v2141_v24, %v215_v17  ;;  %v2321_v1 = vsub.f32 %v2143_v25, %v215_v17  ;;  %v158_v11 = vpop.xlane.xlu0 %157  ;;  %v348_v19 = vadd.f32 %v294_v38, %v293_v8 }
  0xd3   :  { %v216_v3 = vmul.f32 0.00390625, %v158_v11  ;;  %343 = vadd.xlane.f32.xlu0 %v342_v12  ;;  %346 = vadd.xlane.f32.xlu1 %v345_v50  ;;  %v161_v18 = vpop.xlane.xlu1 %160  ;;  %v295_v22 = vmul.f32 %v2312_v13, %v2312_v13  ;;  %v296_v10 = vmul.f32 %v2315_v21, %v2315_v21 }
  0xd4   :  { %v217_v23 = vmul.f32 0.00390625, %v161_v18  ;;  %v297_v16 = vmul.f32 %v2318_v51, %v2318_v51  ;;  %v298_v17 = vmul.f32 %v2321_v1, %v2321_v1 }
  0xd5   :  { %v2332_v0 = vsub.f32 %v2149_v28, %v216_v3  ;;  %v2335_v12 = vsub.f32 %v2151_v29, %v216_v3  ;;  %v351_v8 = vadd.f32 %v296_v10, %v295_v22 }
  0xd6   :  { %v2338_v38 = vsub.f32 %v2153_v30, %v217_v23  ;;  %v2341_v50 = vsub.f32 %v2155_v31, %v217_v23  ;;  %v164_v18 = vpop.xlane.xlu0 %163  ;;  %v354_v25 = vadd.f32 %v298_v17, %v297_v16 }
  0xd7   :  { %v218_v11 = vmul.f32 0.00390625, %v164_v18  ;;  %349 = vadd.xlane.f32.xlu0 %v348_v19  ;;  %352 = vadd.xlane.f32.xlu1 %v351_v8  ;;  %v167_v24 = vpop.xlane.xlu1 %166  ;;  %v299_v28 = vmul.f32 %v2332_v0, %v2332_v0  ;;  %v300_v3 = vmul.f32 %v2335_v12, %v2335_v12 }
  0xd8   :  { %v219_v29 = vmul.f32 0.00390625, %v167_v24  ;;  %v301_v22 = vmul.f32 %v2338_v38, %v2338_v38  ;;  %v302_v23 = vmul.f32 %v2341_v50, %v2341_v50 }
  0xd9   :  { %v2352_v10 = vsub.f32 %v2161_v34, %v218_v11  ;;  %v2355_v19 = vsub.f32 %v2163_v35, %v218_v11  ;;  %v357_v16 = vadd.f32 %v300_v3, %v299_v28 }
  0xda   :  { %v2358_v17 = vsub.f32 %v2165_v36, %v219_v29  ;;  %v2361_v8 = vsub.f32 %v2167_v37, %v219_v29  ;;  %v170_v24 = vpop.xlane.xlu0 %169  ;;  %v360_v31 = vadd.f32 %v302_v23, %v301_v22 }
  0xdb   :  { %v220_v18 = vmul.f32 0.00390625, %v170_v24  ;;  %355 = vadd.xlane.f32.xlu0 %v354_v25  ;;  %358 = vadd.xlane.f32.xlu1 %v357_v16  ;;  %v173_v30 = vpop.xlane.xlu1 %172  ;;  %v303_v34 = vmul.f32 %v2352_v10, %v2352_v10  ;;  %v304_v11 = vmul.f32 %v2355_v19, %v2355_v19 }
  0xdc   :  { %v221_v35 = vmul.f32 0.00390625, %v173_v30  ;;  %v305_v28 = vmul.f32 %v2358_v17, %v2358_v17  ;;  %v306_v29 = vmul.f32 %v2361_v8, %v2361_v8 }
  0xdd   :  { %v2372_v3 = vsub.f32 %v2173_v40, %v220_v18  ;;  %v2375_v25 = vsub.f32 %v2175_v41, %v220_v18  ;;  %v363_v22 = vadd.f32 %v304_v11, %v303_v34 }
  0xde   :  { %v2378_v23 = vsub.f32 %v2177_v42, %v221_v35  ;;  %v2381_v16 = vsub.f32 %v2179_v43, %v221_v35  ;;  %v176_v30 = vpop.xlane.xlu0 %175  ;;  %v366_v37 = vadd.f32 %v306_v29, %v305_v28 }
  0xdf   :  { %v222_v24 = vmul.f32 0.00390625, %v176_v30  ;;  %361 = vadd.xlane.f32.xlu0 %v360_v31  ;;  %364 = vadd.xlane.f32.xlu1 %v363_v22  ;;  %v179_v36 = vpop.xlane.xlu1 %178  ;;  %v307_v40 = vmul.f32 %v2372_v3, %v2372_v3  ;;  %v308_v18 = vmul.f32 %v2375_v25, %v2375_v25 }
  0xe0   :  { %v223_v41 = vmul.f32 0.00390625, %v179_v36  ;;  %v309_v34 = vmul.f32 %v2378_v23, %v2378_v23  ;;  %v310_v35 = vmul.f32 %v2381_v16, %v2381_v16 }
  0xe1   :  { %v2392_v11 = vsub.f32 %v2185_v46, %v222_v24  ;;  %v2395_v31 = vsub.f32 %v2187_v47, %v222_v24  ;;  %v369_v28 = vadd.f32 %v308_v18, %v307_v40 }
  0xe2   :  { %v2398_v29 = vsub.f32 %v2189_v48, %v223_v41  ;;  %v2401_v22 = vsub.f32 %v2191_v49, %v223_v41  ;;  %v182_v36 = vpop.xlane.xlu0 %181  ;;  %v372_v43 = vadd.f32 %v310_v35, %v309_v34 }
  0xe3   :  { %v224_v30 = vmul.f32 0.00390625, %v182_v36  ;;  %367 = vadd.xlane.f32.xlu0 %v366_v37  ;;  %370 = vadd.xlane.f32.xlu1 %v369_v28  ;;  %v185_v42 = vpop.xlane.xlu1 %184  ;;  %v311_v46 = vmul.f32 %v2392_v11, %v2392_v11  ;;  %v312_v24 = vmul.f32 %v2395_v31, %v2395_v31 }
  0xe4   :  { %v225_v47 = vmul.f32 0.00390625, %v185_v42  ;;  %v313_v40 = vmul.f32 %v2398_v29, %v2398_v29  ;;  %v314_v41 = vmul.f32 %v2401_v22, %v2401_v22 }
  0xe5   :  { %v2412_v18 = vsub.f32 %v2197_v52, %v224_v30  ;;  %v2415_v37 = vsub.f32 %v2199_v53, %v224_v30  ;;  %v375_v34 = vadd.f32 %v312_v24, %v311_v46 }
  0xe6   :  { %v2418_v35 = vsub.f32 %v2201_v54, %v225_v47  ;;  %v2421_v28 = vsub.f32 %v2203_v55, %v225_v47  ;;  %v188_v42 = vpop.xlane.xlu0 %187  ;;  %v378_v49 = vadd.f32 %v314_v41, %v313_v40 }
  0xe7   :  { %v226_v36 = vmul.f32 0.00390625, %v188_v42  ;;  %373 = vadd.xlane.f32.xlu0 %v372_v43  ;;  %376 = vadd.xlane.f32.xlu1 %v375_v34  ;;  %v191_v48 = vpop.xlane.xlu1 %190  ;;  %v315_v52 = vmul.f32 %v2412_v18, %v2412_v18  ;;  %v316_v30 = vmul.f32 %v2415_v37, %v2415_v37 }
  0xe8   :  { %v227_v53 = vmul.f32 0.00390625, %v191_v48  ;;  %v317_v46 = vmul.f32 %v2418_v35, %v2418_v35  ;;  %v318_v47 = vmul.f32 %v2421_v28, %v2421_v28 }
  0xe9   :  { %v2432_v24 = vsub.f32 %v2209_v58, %v226_v36  ;;  %v2435_v43 = vsub.f32 %v2211_v59, %v226_v36  ;;  %v381_v40 = vadd.f32 %v316_v30, %v315_v52 }
  0xea   :  { %v2438_v41 = vsub.f32 %v2213_v60, %v227_v53  ;;  %v2441_v34 = vsub.f32 %v2215_v61, %v227_v53  ;;  %v194_v48 = vpop.xlane.xlu0 %193  ;;  %v384_v55 = vadd.f32 %v318_v47, %v317_v46 }
  0xeb   :  { %v228_v42 = vmul.f32 0.00390625, %v194_v48  ;;  %379 = vadd.xlane.f32.xlu0 %v378_v49  ;;  %382 = vadd.xlane.f32.xlu1 %v381_v40  ;;  %v197_v54 = vpop.xlane.xlu1 %196  ;;  %v319_v58 = vmul.f32 %v2432_v24, %v2432_v24  ;;  %v320_v36 = vmul.f32 %v2435_v43, %v2435_v43 }
  0xec   :  { %v229_v59 = vmul.f32 0.00390625, %v197_v54  ;;  %v321_v52 = vmul.f32 %v2438_v41, %v2438_v41  ;;  %v322_v53 = vmul.f32 %v2441_v34, %v2441_v34 }
  0xed   :  { %v2452_v30 = vsub.f32 %v2221_v5, %v228_v42  ;;  %v2455_v49 = vsub.f32 %v2223_v9, %v228_v42  ;;  %v387_v46 = vadd.f32 %v320_v36, %v319_v58 }
  0xee   :  { %v2458_v47 = vsub.f32 %v2225_v14, %v229_v59  ;;  %v2461_v40 = vsub.f32 %v2227_v15, %v229_v59  ;;  %v200_v54 = vpop.xlane.xlu0 %199  ;;  %v390_v61 = vadd.f32 %v322_v53, %v321_v52 }
  0xef   :  { %v230_v48 = vmul.f32 0.00390625, %v200_v54  ;;  %385 = vadd.xlane.f32.xlu0 %v384_v55  ;;  %388 = vadd.xlane.f32.xlu1 %v387_v46  ;;  %v203_v60 = vpop.xlane.xlu1 %202  ;;  %v323_v5 = vmul.f32 %v2452_v30, %v2452_v30  ;;  %v324_v42 = vmul.f32 %v2455_v49, %v2455_v49 }
  0xf0   :  { %v231_v9 = vmul.f32 0.00390625, %v203_v60  ;;  %v325_v58 = vmul.f32 %v2458_v47, %v2458_v47  ;;  %v326_v59 = vmul.f32 %v2461_v40, %v2461_v40 }
  0xf1   :  { %v2472_v36 = vsub.f32 %v2233_v26, %v230_v48  ;;  %v2475_v55 = vsub.f32 %v2235_v27, %v230_v48  ;;  %v393_v52 = vadd.f32 %v324_v42, %v323_v5 }
  0xf2   :  { %v2478_v53 = vsub.f32 %v2237_v32, %v231_v9  ;;  %v2481_v46 = vsub.f32 %v2239_v33, %v231_v9  ;;  %v206_v60 = vpop.xlane.xlu0 %205  ;;  %v396_v14 = vadd.f32 %v326_v59, %v325_v58 }
  0xf3   :  { %3417 = vst [vmem:[#allocation69_spill] sm:$0xff] %v2475_v55  ;;  %v232_v54 = vmul.f32 0.00390625, %v206_v60  ;;  %391 = vadd.xlane.f32.xlu0 %v390_v61  ;;  %394 = vadd.xlane.f32.xlu1 %v393_v52  ;;  %v327_v15 = vmul.f32 %v2472_v36, %v2472_v36  ;;  %v328_v26 = vmul.f32 %v2475_v55, %v2475_v55 }
  0xf4   :  { %3418 = vst [vmem:[#allocation70_spill] sm:$0xff] %v2478_v53  ;;  %3419 = vst [vmem:[#allocation71_spill] sm:$0xff] %v2481_v46  ;;  %v329_v5 = vmul.f32 %v2478_v53, %v2478_v53  ;;  %v330_v48 = vmul.f32 %v2481_v46, %v2481_v46 }
  0xf5   :  { %v2492_v9 = vsub.f32 %v2245_v44, %v232_v54  ;;  %v2495_v42 = vsub.f32 %v2247_v45, %v232_v54  ;;  %v399_v61 = vadd.f32 %v328_v26, %v327_v15 }
  0xf6   :  { %v402_v58 = vadd.f32 %v330_v48, %v329_v5 }
  0xf7   :  { %397 = vadd.xlane.f32.xlu0 %v396_v14  ;;  %400 = vadd.xlane.f32.xlu1 %v399_v61  ;;  %v331_v59 = vmul.f32 %v2492_v9, %v2492_v9  ;;  %v332_v52 = vmul.f32 %v2495_v42, %v2495_v42 }
  0xf9   :  { %v405_v60 = vadd.f32 %v332_v52, %v331_v59 }
  0xfb   :  { %403 = vadd.xlane.f32.xlu0 %v402_v58  ;;  %406 = vadd.xlane.f32.xlu1 %v405_v60 }
 0x154   :  { %v335_v27 = vpop.xlane.xlu1 %334 }
 0x155   :  { %v408_v32 = vmul.f32 0.00390625, %v335_v27 }
 0x157   :  { %v433_v33 = vadd.f32 1e-05, %v408_v32 }
 0x158   :  { %v341_v44 = vpop.xlane.xlu1 %340  ;;  %v338_v46 = vpop.xlane.xlu0 %337 }
 0x159   :  { %v410_v54 = vmul.f32 0.00390625, %v341_v44  ;;  %v409_v45 = vmul.f32 0.00390625, %v338_v46  ;;  %1748 = vrsqrt.f32 %v433_v33 }
 0x15b   :  { %v434_v15 = vadd.f32 1e-05, %v409_v45  ;;  %v435_v14 = vadd.f32 1e-05, %v410_v54 }
 0x15c   :  { %v347_v26 = vpop.xlane.xlu1 %346  ;;  %v344_v5 = vpop.xlane.xlu0 %343 }
 0x15d   :  { %v412_v48 = vmul.f32 0.00390625, %v347_v26  ;;  %v411_v61 = vmul.f32 0.00390625, %v344_v5  ;;  %1750 = vrsqrt.f32 %v434_v15 }
 0x15e   :  { %1752 = vrsqrt.f32 %v435_v14 }
 0x15f   :  { %v436_v53 = vadd.f32 1e-05, %v411_v61  ;;  %v437_v59 = vadd.f32 1e-05, %v412_v48 }
 0x160   :  { %v353_v58 = vpop.xlane.xlu1 %352  ;;  %v350_v52 = vpop.xlane.xlu0 %349 }
 0x161   :  { %v414_v60 = vmul.f32 0.00390625, %v353_v58  ;;  %v413_v27 = vmul.f32 0.00390625, %v350_v52  ;;  %1754 = vrsqrt.f32 %v436_v53 }
 0x162   :  { %1756 = vrsqrt.f32 %v437_v59 }
 0x163   :  { %v439_v32 = vadd.f32 1e-05, %v414_v60  ;;  %v438_v55 = vadd.f32 1e-05, %v413_v27 }
 0x164   :  { %v359_v44 = vpop.xlane.xlu1 %358  ;;  %v356_v45 = vpop.xlane.xlu0 %355 }
 0x165   :  { %v416_v33 = vmul.f32 0.00390625, %v359_v44  ;;  %v415_v46 = vmul.f32 0.00390625, %v356_v45  ;;  %1758 = vrsqrt.f32 %v438_v55 }
 0x166   :  { %1760 = vrsqrt.f32 %v439_v32  ;;  %v1749_v14 = vpop.eup %1748 }
 0x167   :  { %v441_v54 = vadd.f32 1e-05, %v416_v33  ;;  %v440_v26 = vadd.f32 1e-05, %v415_v46  ;;  %v2502_v59 = vmul.f32 %v1749_v14, %v2252_v63  ;;  %v2505_v60 = vmul.f32 %v1749_v14, %v2255_v20 }
 0x168   :  { %v365_v15 = vpop.xlane.xlu1 %364  ;;  %v362_v5 = vpop.xlane.xlu0 %361 }
 0x169   :  { %v418_v48 = vmul.f32 0.00390625, %v365_v15  ;;  %v417_v61 = vmul.f32 0.00390625, %v362_v5  ;;  %1762 = vrsqrt.f32 %v440_v26  ;;  %3420 = vst [vmem:[#allocation72_spill] sm:$0xff] %v2505_v60  ;;  %v3422_v15 = vld [vmem:[#allocation67_spill] sm:$0xff] }
 0x16a   :  { %v1751_v58 = vpop.eup %1750  ;;  %1764 = vrsqrt.f32 %v441_v54 }
 0x16b   :  { %v443_v53 = vadd.f32 1e-05, %v418_v48  ;;  %v442_v52 = vadd.f32 1e-05, %v417_v61  ;;  %v2508_v55 = vmul.f32 %v1751_v58, %v2272_v2  ;;  %v2511_v27 = vmul.f32 %v1751_v58, %v2275_v62  ;;  %v1753_v45 = vpop.eup %1752  ;;  %v3424_v62 = vld [vmem:[#allocation68_spill] sm:$0xff] }
 0x16c   :  { %v371_v32 = vpop.xlane.xlu1 %370  ;;  %v368_v44 = vpop.xlane.xlu0 %367  ;;  %v2518_v5 = vmul.f32 %v1753_v45, %v3422_v15  ;;  %v2521_v14 = vmul.f32 %v1753_v45, %v3424_v62 }
 0x16d   :  { %3421 = vst [vmem:[#allocation73_spill] sm:$0xff] %v2511_v27  ;;  %v420_v33 = vmul.f32 0.00390625, %v371_v32  ;;  %v419_v46 = vmul.f32 0.00390625, %v368_v44  ;;  %1766 = vrsqrt.f32 %v442_v52 }
 0x16e   :  { %v1755_v20 = vpop.eup %1754  ;;  %1768 = vrsqrt.f32 %v443_v53  ;;  %3423 = vst [vmem:[#allocation67_spill] sm:$0xff] %v2518_v5  ;;  %3425 = vst [vmem:[#allocation68_spill] sm:$0xff] %v2521_v14 }
 0x16f   :  { %v445_v26 = vadd.f32 1e-05, %v420_v33  ;;  %v444_v2 = vadd.f32 1e-05, %v419_v46  ;;  %v2524_v48 = vmul.f32 %v1755_v20, %v2278_v6  ;;  %v2527_v61 = vmul.f32 %v1755_v20, %v2281_v7  ;;  %v1757_v44 = vpop.eup %1756 }
 0x170   :  { %v377_v58 = vpop.xlane.xlu1 %376  ;;  %v374_v32 = vpop.xlane.xlu0 %373  ;;  %v2534_v7 = vmul.f32 %v1757_v44, %v2292_v57  ;;  %v2537_v20 = vmul.f32 %v1757_v44, %v2295_v4 }
 0x171   :  { %3426 = vst [vmem:[#allocation74_spill] sm:$0xff] %v2524_v48  ;;  %v422_v52 = vmul.f32 0.00390625, %v377_v58  ;;  %v421_v54 = vmul.f32 0.00390625, %v374_v32  ;;  %1770 = vrsqrt.f32 %v444_v2 }
 0x172   :  { %v1759_v45 = vpop.eup %1758  ;;  %1772 = vrsqrt.f32 %v445_v26  ;;  %3427 = vst [vmem:[#allocation75_spill] sm:$0xff] %v2534_v7  ;;  %3428 = vst [vmem:[#allocation76_spill] sm:$0xff] %v2537_v20 }
 0x173   :  { %v447_v46 = vadd.f32 1e-05, %v422_v52  ;;  %v446_v6 = vadd.f32 1e-05, %v421_v54  ;;  %v1761_v15 = vpop.eup %1760  ;;  %v2540_v62 = vmul.f32 %v1759_v45, %v2298_v56  ;;  %v2543_v58 = vmul.f32 %v1759_v45, %v2301_v39 }
 0x174   :  { %v383_v32 = vpop.xlane.xlu1 %382  ;;  %v380_v53 = vpop.xlane.xlu0 %379  ;;  %v2550_v4 = vmul.f32 %v1761_v15, %v2312_v13  ;;  %v2553_v39 = vmul.f32 %v1761_v15, %v2315_v21 }
 0x175   :  { %v424_v2 = vmul.f32 0.00390625, %v383_v32  ;;  %v423_v33 = vmul.f32 0.00390625, %v380_v53  ;;  %1774 = vrsqrt.f32 %v446_v6 }
 0x176   :  { %v1763_v26 = vpop.eup %1762  ;;  %3429 = vst [vmem:[#allocation77_spill] sm:$0xff] %v2550_v4  ;;  %1776 = vrsqrt.f32 %v447_v46  ;;  %3430 = vst [vmem:[#allocation78_spill] sm:$0xff] %v2553_v39 }
 0x177   :  { %v448_v56 = vadd.f32 1e-05, %v423_v33  ;;  %v1765_v44 = vpop.eup %1764  ;;  %v2556_v52 = vmul.f32 %v1763_v26, %v2318_v51  ;;  %v2559_v53 = vmul.f32 %v1763_v26, %v2321_v1  ;;  %v449_v45 = vadd.f32 1e-05, %v424_v2 }
 0x178   :  { %v389_v32 = vpop.xlane.xlu1 %388  ;;  %v386_v54 = vpop.xlane.xlu0 %385  ;;  %v2566_v46 = vmul.f32 %v1765_v44, %v2332_v0  ;;  %v2569_v51 = vmul.f32 %v1765_v44, %v2335_v12 }
 0x179   :  { %3431 = vst [vmem:[#allocation79_spill] sm:$0xff] %v2556_v52  ;;  %3432 = vst [vmem:[#allocation80_spill] sm:$0xff] %v2559_v53  ;;  %v426_v6 = vmul.f32 0.00390625, %v389_v32  ;;  %v425_v57 = vmul.f32 0.00390625, %v386_v54  ;;  %1778 = vrsqrt.f32 %v448_v56 }
 0x17a   :  { %v1767_v21 = vpop.eup %1766  ;;  %3433 = vst [vmem:[#allocation81_spill] sm:$0xff] %v2566_v46  ;;  %3434 = vst [vmem:[#allocation82_spill] sm:$0xff] %v2569_v51  ;;  %1780 = vrsqrt.f32 %v449_v45 }
 0x17b   :  { %v450_v1 = vadd.f32 1e-05, %v425_v57  ;;  %v1769_v15 = vpop.eup %1768  ;;  %v2572_v2 = vmul.f32 %v1767_v21, %v2338_v38  ;;  %v2575_v54 = vmul.f32 %v1767_v21, %v2341_v50  ;;  %v451_v26 = vadd.f32 1e-05, %v426_v6 }
 0x17c   :  { %v395_v32 = vpop.xlane.xlu1 %394  ;;  %v392_v13 = vpop.xlane.xlu0 %391  ;;  %v2582_v38 = vmul.f32 %v1769_v15, %v2352_v10  ;;  %v2585_v50 = vmul.f32 %v1769_v15, %v2355_v19 }
 0x17d   :  { %3435 = vst [vmem:[#allocation83_spill] sm:$0xff] %v2572_v2  ;;  %3436 = vst [vmem:[#allocation84_spill] sm:$0xff] %v2575_v54  ;;  %v428_v56 = vmul.f32 0.00390625, %v395_v32  ;;  %v427_v33 = vmul.f32 0.00390625, %v392_v13  ;;  %1782 = vrsqrt.f32 %v450_v1 }
 0x17e   :  { %v1771_v57 = vpop.eup %1770  ;;  %3437 = vst [vmem:[#allocation85_spill] sm:$0xff] %v2582_v38  ;;  %3438 = vst [vmem:[#allocation86_spill] sm:$0xff] %v2585_v50  ;;  %1784 = vrsqrt.f32 %v451_v26 }
 0x17f   :  { %v452_v44 = vadd.f32 1e-05, %v427_v33  ;;  %v1773_v45 = vpop.eup %1772  ;;  %v2588_v6 = vmul.f32 %v1771_v57, %v2358_v17  ;;  %v2591_v13 = vmul.f32 %v1771_v57, %v2361_v8  ;;  %v453_v21 = vadd.f32 1e-05, %v428_v56 }
 0x180   :  { %v401_v32 = vpop.xlane.xlu1 %400  ;;  %v398_v0 = vpop.xlane.xlu0 %397  ;;  %v2598_v17 = vmul.f32 %v1773_v45, %v2372_v3  ;;  %v2601_v8 = vmul.f32 %v1773_v45, %v2375_v25 }
 0x181   :  { %3439 = vst [vmem:[#allocation87_spill] sm:$0xff] %v2588_v6  ;;  %3440 = vst [vmem:[#allocation88_spill] sm:$0xff] %v2591_v13  ;;  %v430_v1 = vmul.f32 0.00390625, %v401_v32  ;;  %v429_v12 = vmul.f32 0.00390625, %v398_v0  ;;  %1786 = vrsqrt.f32 %v452_v44 }
 0x182   :  { %v1775_v33 = vpop.eup %1774  ;;  %3441 = vst [vmem:[#allocation89_spill] sm:$0xff] %v2598_v17  ;;  %3442 = vst [vmem:[#allocation90_spill] sm:$0xff] %v2601_v8  ;;  %1788 = vrsqrt.f32 %v453_v21 }
 0x183   :  { %v454_v15 = vadd.f32 1e-05, %v429_v12  ;;  %v1777_v26 = vpop.eup %1776  ;;  %v2604_v56 = vmul.f32 %v1775_v33, %v2378_v23  ;;  %v2607_v0 = vmul.f32 %v1775_v33, %v2381_v16  ;;  %v455_v57 = vadd.f32 1e-05, %v430_v1 }
 0x184   :  { %v407_v32 = vpop.xlane.xlu1 %406  ;;  %v404_v10 = vpop.xlane.xlu0 %403  ;;  %v2614_v23 = vmul.f32 %v1777_v26, %v2392_v11  ;;  %v2617_v21 = vmul.f32 %v1777_v26, %v2395_v31 }
 0x185   :  { %3443 = vst [vmem:[#allocation91_spill] sm:$0xff] %v2607_v0  ;;  %v432_v44 = vmul.f32 0.00390625, %v407_v32  ;;  %v431_v19 = vmul.f32 0.00390625, %v404_v10  ;;  %1790 = vrsqrt.f32 %v454_v15 }
 0x186   :  { %v1779_v12 = vpop.eup %1778  ;;  %3444 = vst [vmem:[#allocation92_spill] sm:$0xff] %v2614_v23  ;;  %3445 = vst [vmem:[#allocation93_spill] sm:$0xff] %v2617_v21  ;;  %1792 = vrsqrt.f32 %v455_v57 }
 0x187   :  { %v457_v45 = vadd.f32 1e-05, %v432_v44  ;;  %v456_v16 = vadd.f32 1e-05, %v431_v19  ;;  %v2620_v1 = vmul.f32 %v1779_v12, %v2398_v29  ;;  %v2623_v10 = vmul.f32 %v1779_v12, %v2401_v22  ;;  %v1781_v33 = vpop.eup %1780 }
 0x188   :  { %v2630_v31 = vmul.f32 %v1781_v33, %v2412_v18  ;;  %v2633_v29 = vmul.f32 %v1781_v33, %v2415_v37 }
 0x189   :  { %3446 = vst [vmem:[#allocation94_spill] sm:$0xff] %v2620_v1  ;;  %3447 = vst [vmem:[#allocation95_spill] sm:$0xff] %v2623_v10  ;;  %1794 = vrsqrt.f32 %v457_v45 }
 0x18a   :  { %1796 = vrsqrt.f32 %v456_v16  ;;  %v1783_v19 = vpop.eup %1782  ;;  %3448 = vst [vmem:[#allocation96_spill] sm:$0xff] %v2630_v31  ;;  %3449 = vst [vmem:[#allocation97_spill] sm:$0xff] %v2633_v29  ;;  %v3467_v16 = vld [vmem:[#allocation71_spill] sm:$0xff] }
 0x18b   :  { %v2636_v22 = vmul.f32 %v1783_v19, %v2418_v35  ;;  %v2639_v26 = vmul.f32 %v1783_v19, %v2421_v28  ;;  %v1785_v57 = vpop.eup %1784 }
 0x18c   :  { %v2646_v18 = vmul.f32 %v1785_v57, %v2432_v24  ;;  %v2649_v37 = vmul.f32 %v1785_v57, %v2435_v43 }
 0x18d   :  { %3450 = vst [vmem:[#allocation98_spill] sm:$0xff] %v2636_v22  ;;  %3451 = vst [vmem:[#allocation99_spill] sm:$0xff] %v2639_v26 }
 0x18e   :  { %v1787_v12 = vpop.eup %1786  ;;  %3452 = vst [vmem:[#allocation100_spill] sm:$0xff] %v2646_v18  ;;  %3453 = vst [vmem:[#allocation101_spill] sm:$0xff] %v2649_v37 }
 0x18f   :  { %v2652_v35 = vmul.f32 %v1787_v12, %v2438_v41  ;;  %v2655_v28 = vmul.f32 %v1787_v12, %v2441_v34  ;;  %v1789_v45 = vpop.eup %1788 }
 0x190   :  { %v2662_v24 = vmul.f32 %v1789_v45, %v2452_v30  ;;  %v2665_v43 = vmul.f32 %v1789_v45, %v2455_v49 }
 0x191   :  { %3454 = vst [vmem:[#allocation102_spill] sm:$0xff] %v2652_v35  ;;  %3455 = vst [vmem:[#allocation103_spill] sm:$0xff] %v2655_v28 }
 0x192   :  { %v1791_v19 = vpop.eup %1790  ;;  %3456 = vst [vmem:[#allocation104_spill] sm:$0xff] %v2662_v24  ;;  %3457 = vst [vmem:[#allocation105_spill] sm:$0xff] %v2665_v43 }
 0x193   :  { %v2668_v41 = vmul.f32 %v1791_v19, %v2458_v47  ;;  %v2671_v34 = vmul.f32 %v1791_v19, %v2461_v40  ;;  %v1793_v57 = vpop.eup %1792  ;;  %v3463_v40 = vld [vmem:[#allocation69_spill] sm:$0xff]  ;;  %v3465_v19 = vld [vmem:[#allocation70_spill] sm:$0xff] }
 0x194   :  { %v2684_v47 = vmul.f32 %v1793_v57, %v2472_v36  ;;  %v2687_v45 = vmul.f32 %v1793_v57, %v3463_v40  ;;  %v2703_v57 = vmov 0.0  }
 0x195   :  { %3458 = vst [vmem:[#allocation106_spill] sm:$0xff] %v2668_v41  ;;  %3459 = vst [vmem:[#allocation107_spill] sm:$0xff] %v2671_v34 }
 0x196   :  { %v1795_v12 = vpop.eup %1794  ;;  %3462 = vst [vmem:[#allocation110_spill] sm:$0xff] %v2684_v47  ;;  %3464 = vst [vmem:[#allocation69_spill] sm:$0xff] %v2687_v45 }
 0x197   :  { %v1797_v32 = vpop.eup %1796  ;;  %v2678_v30 = vmul.f32 %v1795_v12, %v2492_v9  ;;  %v2681_v49 = vmul.f32 %v1795_v12, %v2495_v42  ;;  %v2705_v12 = vmov 0.0  }
 0x198   :  { %v2690_v44 = vmul.f32 %v1797_v32, %v3465_v19  ;;  %v2693_v15 = vmul.f32 %v1797_v32, %v3467_v16 }
 0x199   :  { %3460 = vst [vmem:[#allocation108_spill] sm:$0xff] %v2678_v30  ;;  %3461 = vst [vmem:[#allocation109_spill] sm:$0xff] %v2681_v49 }
 0x19a   :  { %3466 = vst [vmem:[#allocation70_spill] sm:$0xff] %v2690_v44  ;;  %3468 = vst [vmem:[#allocation71_spill] sm:$0xff] %v2693_v15 }
 0x19b LB: > { %3469 = vst [vmem:[#allocation111_spill] sm:$0xff] %v2020_v57  ;;  %3470 = vst [vmem:[#allocation112_spill] sm:$0xff] %v2024_v12  ;;  %v3471_v27 = vld [vmem:[#allocation73_spill] sm:$0xff]  ;;  %v3472_v60 = vld [vmem:[#allocation72_spill] sm:$0xff]  ;;  %s1640_s4 = sshll.u32 %s2028_s3, 8  ;;  %vm1212_vm0 = vcmask 588800   ;;  %s2028_s3 = sphi %s2707_s3, %s578_s3   ;;  %v2024_v12 = vphi %v2705_v12, %v3554_v12   ;;  %v2020_v57 = vphi %v2703_v57, %v3553_v57  }
 0x19c   : > { %v3473_v63 = vpack.c.bf16 %v3471_v27, %v3472_v60  ;;  %s2722_s22 = sshra.s32 %s1640_s4, 7  ;;  %s2725_s24 = scalar_lea.vmem [#allocation8], %s1640_s4  ;;  %v3475_v14 = vld [vmem:[#allocation68_spill] sm:$0xff]  ;;  %v3477_v48 = vld [vmem:[#allocation74_spill] sm:$0xff]  ;;  %v3478_v5 = vld [vmem:[#allocation67_spill] sm:$0xff]  ;;  %vm1216_vm1 = vcmask 1043456  }
 0x19d   : > { %s1641_s23 = sshll.u32 %s2722_s22, 2  ;;  %v3480_v20 = vld [vmem:[#allocation76_spill] sm:$0xff]  ;;  %v3482_v7 = vld [vmem:[#allocation75_spill] sm:$0xff]  ;;  %v3485_v39 = vld [vmem:[#allocation78_spill] sm:$0xff]  ;;  %s618_s26 = scalar_lea.vmem [#allocation7], %s2722_s22 }
 0x19e   : > { %823 = vmatprep.mubr.bf16.mxu0 %v3473_v63  ;;  %s2727_s25 = scalar_lea.vmem [#allocation5], %s1641_s23  ;;  %v3484_v53 = vld [vmem:[#allocation80_spill] sm:$0xff]  ;;  %v3487_v52 = vld [vmem:[#allocation79_spill] sm:$0xff]  ;;  %v3488_v4 = vld [vmem:[#allocation77_spill] sm:$0xff]  ;;  %s578_s3 = sadd.s32 1, %s2028_s3  }
 0x19f   : > { %v600_v32 = vld [vmem:[%s2727_s25 + $0x1c0] sm:$0xff]  ;;  %v3491_v51 = vld [vmem:[#allocation82_spill] sm:$0xff]  ;;  %v3494_v46 = vld [vmem:[#allocation81_spill] sm:$0xff]  ;;  %p575_p6 = scmp.ge.s32.totalorder %s578_s3, 4  }
 0x1a0   : > { %v601_v16 = vld [vmem:[%s2727_s25 + $0x1e0] sm:$0xff]  ;;  %v3497_v50 = vld [vmem:[#allocation86_spill] sm:$0xff]  ;;  %v3500_v38 = vld [vmem:[#allocation85_spill] sm:$0xff]  ;;  %s2040_s29 = smov (%p575_p6), [#allocation10]  }
 0x1a1   : > { %v598_v40 = vld [vmem:[%s2727_s25 + $0x180] sm:$0xff]  ;;  %v1657_v19 = vcombine.high %v600_v32, %v601_v16  ;;  %v1656_v63 = vcombine.low %v600_v32, %v601_v16  ;;  %v3503_v8 = vld [vmem:[#allocation90_spill] sm:$0xff]  ;;  %v3505_v17 = vld [vmem:[#allocation89_spill] sm:$0xff]  ;;  %s1612_s30 = sshll.u32 (%p575_p6), %s2040_s29, 4  ;;  %s1613_s30 = int_to_ptr.vmem [resolvable:$true] %s1612_s30 }
 0x1a2   : > { %v599_v33 = vld [vmem:[%s2727_s25 + $0x1a0] sm:$0xff]  ;;  %v3508_v21 = vld [vmem:[#allocation93_spill] sm:$0xff]  ;;  %v3510_v1 = vld [vmem:[#allocation94_spill] sm:$0xff]  ;;  %p1983_p8 = scmp.lt.s32.totalorder (%p575_p6), %s1613_s30, %s1613_s30 }
 0x1a3   : > { %v1655_v9 = vcombine.high %v598_v40, %v599_v33  ;;  %v596_v42 = vld [vmem:[%s2727_s25 + $0x140] sm:$0xff]  ;;  %791 = vmatprep.subr.bf16.mxu0 %v1657_v19  ;;  %v1654_v11 = vcombine.low %v598_v40, %v599_v33  ;;  %v3514_v29 = vld [vmem:[#allocation97_spill] sm:$0xff]  ;;  %v3516_v22 = vld [vmem:[#allocation98_spill] sm:$0xff] }
 0x1a4   : > { %v597_v36 = vld [vmem:[%s2727_s25 + $0x160] sm:$0xff]  ;;  %792 = vmatpush1.bf16.msra.mxu0 %v1656_v63  ;;  %v3520_v37 = vld [vmem:[#allocation101_spill] sm:$0xff]  ;;  %v3522_v35 = vld [vmem:[#allocation102_spill] sm:$0xff] }
 0x1a5   : > { %793 = vmatprep.subr.bf16.mxu0 %v1655_v9  ;;  %v1653_v3 = vcombine.high %v596_v42, %v597_v36  ;;  %v594_v25 = vld [vmem:[%s2727_s25 + $0x100] sm:$0xff]  ;;  %v1652_v60 = vcombine.low %v596_v42, %v597_v36  ;;  %v3526_v43 = vld [vmem:[#allocation105_spill] sm:$0xff]  ;;  %v3528_v41 = vld [vmem:[#allocation106_spill] sm:$0xff] }
 0x1a6   : > { %v595_v27 = vld [vmem:[%s2727_s25 + $0x120] sm:$0xff]  ;;  %v3532_v45 = vld [vmem:[#allocation69_spill] sm:$0xff]  ;;  %v3534_v44 = vld [vmem:[#allocation70_spill] sm:$0xff] }
 0x1a7   : > { %v1651_v32 = vcombine.high %v594_v25, %v595_v27  ;;  %v592_v16 = vld [vmem:[%s2727_s25 + $0xc0] sm:$0xff]  ;;  %v1650_v12 = vcombine.low %v594_v25, %v595_v27  ;;  %v3535_v47 = vld [vmem:[#allocation110_spill] sm:$0xff] }
 0x1a8   : > { %794 = vmatpush1.bf16.msra.mxu0 %v1654_v11  ;;  %v593_v57 = vld [vmem:[%s2727_s25 + $0xe0] sm:$0xff] }
 0x1a9   : > { %795 = vmatprep.subr.bf16.mxu0 %v1653_v3  ;;  %v590_v19 = vld [vmem:[%s2727_s25 + $0x80] sm:$0xff]  ;;  %v1649_v63 = vcombine.high %v592_v16, %v593_v57  ;;  %v1648_v33 = vcombine.low %v592_v16, %v593_v57 }
 0x1aa   : > { %v591_v30 = vld [vmem:[%s2727_s25 + $0xa0] sm:$0xff] }
 0x1ab   : > { %v588_v9 = vld [vmem:[%s2727_s25 + $0x40] sm:$0xff]  ;;  %v1647_v11 = vcombine.high %v590_v19, %v591_v30  ;;  %v1646_v3 = vcombine.low %v590_v19, %v591_v30 }
 0x1ac   : > { %796 = vmatpush1.bf16.msra.mxu0 %v1652_v60  ;;  %v589_v40 = vld [vmem:[%s2727_s25 + $0x60] sm:$0xff] }
 0x1ad   : > { %797 = vmatprep.subr.bf16.mxu0 %v1651_v32  ;;  %v1645_v60 = vcombine.high %v588_v9, %v589_v40  ;;  %v586_v27 = vld [vmem:[%s2727_s25] sm:$0xff]  ;;  %v1644_v42 = vcombine.low %v588_v9, %v589_v40 }
 0x1ae   : > { %v587_v25 = vld [vmem:[%s2727_s25 + $0x20] sm:$0xff] }
 0x1af   : > { %v1643_v36 = vcombine.high %v586_v27, %v587_v25  ;;  %v616_v57 = vld [vmem:[%s2727_s25 + $0x3c0] sm:$0xff]  ;;  %v1642_v32 = vcombine.low %v586_v27, %v587_v25 }
 0x1b0   : > { %798 = vmatpush1.bf16.msra.mxu0 %v1650_v12  ;;  %v617_v12 = vld [vmem:[%s2727_s25 + $0x3e0] sm:$0xff] }
 0x1b1   : > { %799 = vmatprep.subr.bf16.mxu0 %v1649_v63  ;;  %v1673_v16 = vcombine.high %v616_v57, %v617_v12  ;;  %v614_v30 = vld [vmem:[%s2727_s25 + $0x380] sm:$0xff]  ;;  %v1672_v63 = vcombine.low %v616_v57, %v617_v12 }
 0x1b2   : > { %v615_v19 = vld [vmem:[%s2727_s25 + $0x3a0] sm:$0xff] }
 0x1b3   : > { %v612_v9 = vld [vmem:[%s2727_s25 + $0x340] sm:$0xff] }
 0x1b4   : > { %800 = vmatpush1.bf16.msra.mxu0 %v1648_v33  ;;  %v1671_v33 = vcombine.high %v614_v30, %v615_v19  ;;  %v613_v40 = vld [vmem:[%s2727_s25 + $0x360] sm:$0xff] }
 0x1b5   : > { %801 = vmatprep.subr.bf16.mxu0 %v1647_v11  ;;  %v1670_v11 = vcombine.low %v614_v30, %v615_v19  ;;  %v611_v27 = vld [vmem:[%s2727_s25 + $0x320] sm:$0xff]  ;;  %v1668_v25 = vcombine.low %v612_v9, %v613_v40 }
 0x1b6   : > { %v609_v57 = vld [vmem:[%s2727_s25 + $0x2e0] sm:$0xff] }
 0x1b7   : > { %v607_v30 = vld [vmem:[%s2727_s25 + $0x2a0] sm:$0xff] }
 0x1b8   : > { %802 = vmatpush1.bf16.msra.mxu0 %v1646_v3  ;;  %v1669_v3 = vcombine.high %v612_v9, %v613_v40  ;;  %v603_v49 = vld [vmem:[%s2727_s25 + $0x220] sm:$0xff] }
 0x1b9   : > { %803 = vmatprep.subr.bf16.mxu0 %v1645_v60  ;;  %v610_v60 = vld [vmem:[%s2727_s25 + $0x300] sm:$0xff] }
 0x1ba   : > { %v1666_v12 = vcombine.low %v610_v60, %v611_v27  ;;  %v3490_v54 = vld [vmem:[#allocation84_spill] sm:$0xff]  ;;  %v3493_v2 = vld [vmem:[#allocation83_spill] sm:$0xff] }
 0x1bb   : > { %v3496_v13 = vld [vmem:[#allocation88_spill] sm:$0xff]  ;;  %v3499_v6 = vld [vmem:[#allocation87_spill] sm:$0xff] }
 0x1bc   : > { %804 = vmatpush1.bf16.msra.mxu0 %v1644_v42  ;;  %v1667_v42 = vcombine.high %v610_v60, %v611_v27  ;;  %v3502_v0 = vld [vmem:[#allocation91_spill] sm:$0xff]  ;;  %v3511_v23 = vld [vmem:[#allocation92_spill] sm:$0xff] }
 0x1bd   : > { %805 = vmatprep.subr.bf16.mxu0 %v1643_v36  ;;  %v608_v36 = vld [vmem:[%s2727_s25 + $0x2c0] sm:$0xff] }
 0x1be   : > { %v1664_v19 = vcombine.low %v608_v36, %v609_v57  ;;  %v3507_v10 = vld [vmem:[#allocation95_spill] sm:$0xff]  ;;  %v3517_v31 = vld [vmem:[#allocation96_spill] sm:$0xff] }
 0x1bf   : > { %v3513_v26 = vld [vmem:[#allocation99_spill] sm:$0xff]  ;;  %v3523_v18 = vld [vmem:[#allocation100_spill] sm:$0xff] }
 0x1c0   : > { %806 = vmatpush1.bf16.msra.mxu0 %v1642_v32  ;;  %v1665_v32 = vcombine.high %v608_v36, %v609_v57  ;;  %v3476_v36 = vpack.c.bf16 %v2527_v61, %v3475_v14  ;;  %v3479_v57 = vpack.c.bf16 %v3477_v48, %v3478_v5  ;;  %v3519_v28 = vld [vmem:[#allocation103_spill] sm:$0xff]  ;;  %v3529_v24 = vld [vmem:[#allocation104_spill] sm:$0xff]  ;;  %v3567_v61 = vld [vmem:[#allocation37_spill] sm:$0xff] (%p575_p6) }
 0x1c1   : > { %807 = vmatprep.subr.bf16.mxu0 %v1673_v16  ;;  %v606_v16 = vld [vmem:[%s2727_s25 + $0x280] sm:$0xff] }
 0x1c2   : > { %v1662_v9 = vcombine.low %v606_v16, %v607_v30  ;;  %v3525_v34 = vld [vmem:[#allocation107_spill] sm:$0xff] }
 0x1c3   : > { %v3531_v15 = vld [vmem:[#allocation71_spill] sm:$0xff] }
 0x1c4   : > { %808 = vmatpush2.bf16.msra.mxu0 %v1672_v63  ;;  %v1663_v63 = vcombine.high %v606_v16, %v607_v30  ;;  %v3489_v16 = vpack.c.bf16 %v3487_v52, %v3488_v4  ;;  %v3492_v30 = vpack.c.bf16 %v3490_v54, %v3491_v51 }
 0x1c5   : > { %809 = vmatprep.subr.bf16.mxu0 %v1671_v33  ;;  %v604_v33 = vld [vmem:[%s2727_s25 + $0x240] sm:$0xff] }
 0x1c8   : > { %810 = vmatpush2.bf16.msra.mxu0 %v1670_v11  ;;  %v605_v11 = vld [vmem:[%s2727_s25 + $0x260] sm:$0xff] }
 0x1c9   : > { %811 = vmatprep.subr.bf16.mxu0 %v1669_v3  ;;  %v1661_v40 = vcombine.high %v604_v33, %v605_v11  ;;  %v602_v3 = vld [vmem:[%s2727_s25 + $0x200] sm:$0xff] }
 0x1ca   : > { %v1659_v60 = vcombine.high %v602_v3, %v603_v49  ;;  %v1658_v27 = vcombine.low %v602_v3, %v603_v49  ;;  %v3483_v49 = vpack.c.bf16 %v2540_v62, %v3482_v7  ;;  %v3512_v3 = vpack.c.bf16 %v3510_v1, %v3511_v23  ;;  %v3568_v62 = vld [vmem:[#allocation36_spill] sm:$0xff] (%p575_p6) }
 0x1cc   : > { %812 = vmatpush2.bf16.msra.mxu0 %v1668_v25  ;;  %v1660_v25 = vcombine.low %v604_v33, %v605_v11  ;;  %v3501_v33 = vpack.c.bf16 %v3499_v6, %v3500_v38  ;;  %v3504_v11 = vpack.c.bf16 %v3502_v0, %v3503_v8 }
 0x1cd   : > { %813 = vmatprep.subr.bf16.mxu0 %v1667_v42  ;;  %v3474_v42 = vpack.c.bf16 %v2508_v55, %v2502_v59  ;;  %v3565_v59 = vld [vmem:[#allocation39_spill] sm:$0xff] (%p575_p6)  ;;  %v3566_v55 = vld [vmem:[#allocation38_spill] sm:$0xff] (%p575_p6) }
 0x1d0   : > { %814 = vmatpush2.bf16.msra.mxu0 %v1666_v12  ;;  %v3481_v12 = vpack.c.bf16 %v2543_v58, %v3480_v20  ;;  %v3569_v58 = vld [vmem:[#allocation35_spill] sm:$0xff] (%p575_p6) }
 0x1d1   : > { %815 = vmatprep.subr.bf16.mxu0 %v1665_v32  ;;  %v3486_v32 = vpack.c.bf16 %v3484_v53, %v3485_v39 }
 0x1d4   : > { %816 = vmatpush2.bf16.msra.mxu0 %v1664_v19  ;;  %v3495_v19 = vpack.c.bf16 %v3493_v2, %v3494_v46 }
 0x1d5   : > { %817 = vmatprep.subr.bf16.mxu0 %v1663_v63  ;;  %v3498_v63 = vpack.c.bf16 %v3496_v13, %v3497_v50 }
 0x1d8   : > { %818 = vmatpush2.bf16.msra.mxu0 %v1662_v9  ;;  %v3506_v9 = vpack.c.bf16 %v2604_v56, %v3505_v17  ;;  %v3570_v56 = vld [vmem:[#allocation34_spill] sm:$0xff] (%p575_p6) }
 0x1d9   : > { %819 = vmatprep.subr.bf16.mxu0 %v1661_v40  ;;  %v3509_v40 = vpack.c.bf16 %v3507_v10, %v3508_v21 }
 0x1dc   : > { %820 = vmatpush2.bf16.msra.mxu0 %v1660_v25  ;;  %v3515_v25 = vpack.c.bf16 %v3513_v26, %v3514_v29 }
 0x1dd   : > { %821 = vmatprep.subr.bf16.mxu0 %v1659_v60  ;;  %v3518_v60 = vpack.c.bf16 %v3516_v22, %v3517_v31 }
 0x1e0   : > { %822 = vmatpush2.bf16.msra.mxu0 %v1658_v27  ;;  %v3521_v27 = vpack.c.bf16 %v3519_v28, %v3520_v37 }
 0x1e3   : > { %824 = vmatmul.mubr.bf16.vlgmr.msra.gmra.mxu0 %v3474_v42  ;;  %v3524_v42 = vpack.c.bf16 %v3522_v35, %v3523_v18 }
 0x1e4   : > { %833 = vmatprep.mubr.bf16.mxu0 %v3476_v36  ;;  %v3527_v36 = vpack.c.bf16 %v3525_v34, %v3526_v43 }
 0x1eb   : > { %834 = vmatmul.mubr.bf16.gmra.mxu0 %v3479_v57  ;;  %v3530_v57 = vpack.c.bf16 %v3528_v41, %v3529_v24 }
 0x1ec   : > { %843 = vmatprep.mubr.bf16.mxu0 %v3481_v12  ;;  %v3533_v12 = vpack.c.bf16 %v3531_v15, %v3532_v45 }
 0x1f3   : > { %844 = vmatmul.mubr.bf16.gmra.mxu0 %v3483_v49  ;;  %v3536_v49 = vpack.c.bf16 %v3534_v44, %v3535_v47 }
 0x1f4   : > { %853 = vmatprep.mubr.bf16.mxu0 %v3486_v32  ;;  %v3537_v32 = vld [vmem:[#allocation109_spill] sm:$0xff] }
 0x1fb   : > { %854 = vmatmul.mubr.bf16.gmra.mxu0 %v3489_v16  ;;  %v3538_v16 = vpack.c.bf16 %v3537_v32, %v3537_v32 }
 0x1fc   : > { %863 = vmatprep.mubr.bf16.mxu0 %v3492_v30  ;;  %v3539_v30 = vld [vmem:[#allocation108_spill] sm:$0xff] }
 0x203   : > { %864 = vmatmul.mubr.bf16.gmra.mxu0 %v3495_v19  ;;  %v3540_v19 = vpack.c.bf16 %v3539_v30, %v3539_v30 }
 0x204   : > { %873 = vmatprep.mubr.bf16.mxu0 %v3498_v63  ;;  %v621_v63 = vlaneseq }
 0x20b   : > { %874 = vmatmul.mubr.bf16.gmra.mxu0 %v3501_v33  ;;  %v2836_v33 = vshrl.u32 %v621_v63, 7 }
 0x20c   : > { %883 = vmatprep.mubr.bf16.mxu0 %v3504_v11 }
 0x20d   : > { %v3319_v11 = vsub.s32 0, %v2836_v33 }
 0x213   : > { %884 = vmatmul.mubr.bf16.gmra.mxu0 %v3506_v9  ;;  %v619_v9 = vld [vmem:[%s618_s26] sm:$0x3] }
 0x214   : > { %893 = vmatprep.mubr.bf16.mxu0 %v3509_v40  ;;  %v3320_v40 = vsub.s32 1, %v2836_v33 }
 0x21b   : > { %894 = vmatmul.mubr.bf16.gmra.mxu0 %v3512_v3  ;;  %v2843_v3 = vrot.slane %v619_v9, %v3319_v11 }
 0x21c   : > { %903 = vmatprep.mubr.bf16.mxu0 %v3515_v25  ;;  %v2847_v25 = vrot.slane %v619_v9, %v3320_v40 }
 0x223   : > { %904 = vmatmul.mubr.bf16.gmra.mxu0 %v3518_v60 }
 0x224   : > { %913 = vmatprep.mubr.bf16.mxu0 %v3521_v27 }
 0x22b   : > { %914 = vmatmul.mubr.bf16.gmra.mxu0 %v3524_v42 }
 0x22c   : > { %923 = vmatprep.mubr.bf16.mxu0 %v3527_v36 }
 0x233   : > { %924 = vmatmul.mubr.bf16.gmra.mxu0 %v3530_v57 }
 0x234   : > { %933 = vmatprep.mubr.bf16.mxu0 %v3533_v12 }
 0x23b   : > { %934 = vmatmul.mubr.bf16.gmra.mxu0 %v3536_v49 }
 0x23c   : > { %943 = vmatprep.mubr.bf16.mxu0 %v3538_v16 }
 0x243   : > { %944 = vmatmul.mubr.bf16.gmra.mxu0 %v3540_v19 }
 0x2a3   : > { %v825_v60 = vpop.f32.mrf.mxu0 }
 0x2a4   : > { %v826_v27 = vadd.f32 %v825_v60, %v2843_v3 }
 0x2a5   : > { %v827_v42 = vpop.f32.mrf.mxu0 }
 0x2a6   : > { %v828_v36 = vadd.f32 %v827_v42, %v2847_v25 }
 0x2a7   : > { %v829_v57 = vpop.f32.mrf.mxu0 }
 0x2a8   : > { %v830_v12 = vadd.f32 %v829_v57, %v2843_v3 }
 0x2a9   : > { %v831_v49 = vpop.f32.mrf.mxu0 }
 0x2aa   : > { %v2852_v16 = vpack.c.bf16 %v830_v12, %v826_v27  ;;  %v832_v19 = vadd.f32 %v831_v49, %v2847_v25 }
 0x2ab   : > { %v835_v63 = vpop.f32.mrf.mxu0 }
 0x2ac   : > { %v2855_v11 = vpack.c.bf16 %v832_v19, %v828_v36  ;;  %v836_v9 = vadd.f32 %v835_v63, %v2843_v3 }
 0x2ad   : > { %v837_v40 = vpop.f32.mrf.mxu0 }
 0x2ae   : > { %v838_v0 = vadd.f32 %v837_v40, %v2847_v25 }
 0x2af   : > { %v839_v60 = vpop.f32.mrf.mxu0 }
 0x2b0   : > { %v840_v1 = vadd.f32 %v839_v60, %v2843_v3  ;;  %v3541_v60 = vld [vmem:[#allocation18_spill] sm:$0xff] }
 0x2b1   : > { %v841_v42 = vpop.f32.mrf.mxu0 }
 0x2b2   : > { %v2860_v2 = vpack.c.bf16 %v840_v1, %v836_v9  ;;  %v842_v57 = vadd.f32 %v841_v42, %v2847_v25  ;;  %v3542_v1 = vpack.c.bf16 %v3541_v60, %v3541_v60 }
 0x2b3   : > { %v845_v27 = vpop.f32.mrf.mxu0 }
 0x2b4   : > { %v2863_v12 = vpack.c.bf16 %v842_v57, %v838_v0  ;;  %v846_v49 = vadd.f32 %v845_v27, %v2843_v3  ;;  %1675 = vmatprep.mubr.msk.bf16.mxu1 %vm1212_vm0, %v3542_v1 }
 0x2b5   : > { %v847_v36 = vpop.f32.mrf.mxu0 }
 0x2b6   : > { %v848_v1 = vadd.f32 %v847_v36, %v2847_v25 }
 0x2b7   : > { %v849_v19 = vpop.f32.mrf.mxu0 }
 0x2b8   : > { %v850_v63 = vadd.f32 %v849_v19, %v2843_v3 }
 0x2b9   : > { %v851_v4 = vpop.f32.mrf.mxu0 }
 0x2ba   : > { %v2867_v5 = vpack.c.bf16 %v850_v63, %v846_v49  ;;  %v852_v19 = vadd.f32 %v851_v4, %v2847_v25 }
 0x2bb   : > { %v855_v40 = vpop.f32.mrf.mxu0 }
 0x2bc   : > { %v856_v4 = vadd.f32 %v855_v40, %v2843_v3 }
 0x2bd   : > { %v857_v9 = vpop.f32.mrf.mxu0 }
 0x2be   : > { %v858_v49 = vadd.f32 %v857_v9, %v2847_v25  ;;  %v2886_v9 = vpack.c.bf16 %v852_v19, %v848_v1 }
 0x2bf   : > { %v859_v42 = vpop.f32.mrf.mxu0 }
 0x2c0   : > { %v860_v60 = vadd.f32 %v859_v42, %v2843_v3 }
 0x2c1   : > { %v861_v0 = vpop.f32.mrf.mxu0 }
 0x2c2   : > { %v862_v7 = vadd.f32 %v861_v0, %v2847_v25  ;;  %v982_v0 = vmul.bf16 %v2867_v5, %v2867_v5  ;;  %v2891_v36 = vpack.c.bf16 %v860_v60, %v856_v4 }
 0x2c3   : > { %v865_v57 = vpop.f32.mrf.mxu0 }
 0x2c4   : > { %v2879_v13 = vpack.c.bf16 %v862_v7, %v858_v49  ;;  %v1008_v40 = vmul.bf16 %v982_v0, %v2867_v5 }
 0x2c5   : > { %v867_v6 = vpop.f32.mrf.mxu0 }
 0x2c6   : > { %v868_v14 = vadd.f32 %v867_v6, %v2847_v25  ;;  %v985_v6 = vmul.bf16 %v2879_v13, %v2879_v13 }
 0x2c7   : > { %v869_v27 = vpop.f32.mrf.mxu0 }
 0x2c8   : > { %v870_v15 = vadd.f32 %v869_v27, %v2843_v3 }
 0x2c9   : > { %v871_v8 = vpop.f32.mrf.mxu0 }
 0x2ca   : > { %v872_v63 = vadd.f32 %v871_v8, %v2847_v25  ;;  %v866_v8 = vadd.f32 %v865_v57, %v2843_v3 }
 0x2cb   : > { %v875_v10 = vpop.f32.mrf.mxu0 }
 0x2cc   : > { %v2889_v18 = vpack.c.bf16 %v872_v63, %v868_v14  ;;  %v2896_v27 = vpack.c.bf16 %v870_v15, %v866_v8  ;;  %v876_v49 = vadd.f32 %v875_v10, %v2843_v3  ;;  %v983_v14 = vmul.bf16 %v2886_v9, %v2886_v9 }
 0x2cd   : > { %v877_v17 = vpop.f32.mrf.mxu0  ;;  %v984_v15 = vmul.bf16 %v2891_v36, %v2891_v36  ;;  %v1011_v10 = vmul.bf16 %v985_v6, %v2879_v13  ;;  %v1034_v8 = vmul.bf16 1027030327, %v1008_v40 }
 0x2ce   : > { %v987_v57 = vmul.bf16 %v2889_v18, %v2889_v18  ;;  %v878_v63 = vadd.f32 %v877_v17, %v2847_v25  ;;  %v986_v0 = vmul.bf16 %v2896_v27, %v2896_v27 }
 0x2cf   : > { %v879_v42 = vpop.f32.mrf.mxu0  ;;  %v1037_v23 = vmul.bf16 1027030327, %v1011_v10 }
 0x2d0   : > { %v880_v7 = vadd.f32 %v879_v42, %v2843_v3  ;;  %v1009_v42 = vmul.bf16 %v983_v14, %v2886_v9  ;;  %v1013_v21 = vmul.bf16 %v987_v57, %v2889_v18  ;;  %v978_v14 = vmul.bf16 %v2852_v16, %v2852_v16 }
 0x2d1   : > { %v881_v20 = vpop.f32.mrf.mxu0  ;;  %v1063_v31 = vadd.bf16 %v1037_v23, %v2879_v13 }
 0x2d2   : > { %v882_v19 = vadd.f32 %v881_v20, %v2847_v25  ;;  %v2906_v60 = vpack.c.bf16 %v880_v7, %v876_v49  ;;  %v1010_v49 = vmul.bf16 %v984_v15, %v2891_v36  ;;  %v1035_v26 = vmul.bf16 1027030327, %v1009_v42 }
 0x2d3   : > { %v885_v1 = vpop.f32.mrf.mxu0 }
 0x2d4   : > { %v2913_v20 = vpack.c.bf16 %v882_v19, %v878_v63  ;;  %v988_v17 = vmul.bf16 %v2906_v60, %v2906_v60  ;;  %v886_v22 = vadd.f32 %v885_v1, %v2843_v3  ;;  %v1012_v19 = vmul.bf16 %v986_v0, %v2896_v27 }
 0x2d5   : > { %v887_v4 = vpop.f32.mrf.mxu0  ;;  %v1060_v1 = vadd.bf16 %v1034_v8, %v2867_v5  ;;  %v1036_v28 = vmul.bf16 1027030327, %v1010_v49 }
 0x2d6   : > { %v989_v40 = vmul.bf16 %v2913_v20, %v2913_v20  ;;  %v888_v57 = vadd.f32 %v887_v4, %v2847_v25  ;;  %v1014_v10 = vmul.bf16 %v988_v17, %v2906_v60  ;;  %v1038_v4 = vmul.bf16 1027030327, %v1012_v19 }
 0x2d7   : > { %v889_v7 = vpop.f32.mrf.mxu0  ;;  %v1061_v17 = vadd.bf16 %v1035_v26, %v2886_v9  ;;  %v1089_v26 = vmul.bf16 1061961548, %v1063_v31 }
 0x2d8   : > { %v890_v6 = vadd.f32 %v889_v7, %v2843_v3  ;;  %v1039_v7 = vmul.bf16 1027030327, %v1013_v21  ;;  %v979_v21 = vmul.bf16 %v2855_v11, %v2855_v11  ;;  %v1040_v23 = vmul.bf16 1027030327, %v1014_v10 }
 0x2d9   : > { %v891_v63 = vpop.f32.mrf.mxu0 }
 0x2da   : > { %v2928_v24 = vpack.c.bf16 %v890_v6, %v886_v22  ;;  %v892_v15 = vadd.f32 %v891_v63, %v2847_v25  ;;  %v1015_v22 = vmul.bf16 %v989_v40, %v2913_v20  ;;  %v2940_v63 = vmul.bf16 %v978_v14, %v2852_v16 }
 0x2db   : > { %v895_v0 = vpop.f32.mrf.mxu0  ;;  %v1065_v49 = vadd.bf16 %v1039_v7, %v2889_v18  ;;  %v1062_v40 = vadd.bf16 %v1036_v28, %v2891_v36  ;;  %v980_v28 = vmul.bf16 %v2860_v2, %v2860_v2 }
 0x2dc   : > { %v990_v29 = vmul.bf16 %v2928_v24, %v2928_v24  ;;  %v2935_v30 = vpack.c.bf16 %v892_v15, %v888_v57  ;;  %v1086_v57 = vmul.bf16 1061961548, %v1060_v1  ;;  %v896_v15 = vadd.f32 %v895_v0, %v2843_v3 }
 0x2dd   : > { %v897_v6 = vpop.f32.mrf.mxu0  ;;  %v1041_v34 = vmul.bf16 1027030327, %v1015_v22  ;;  %v1066_v0 = vadd.bf16 %v1040_v23, %v2906_v60  ;;  %v1088_v23 = vmul.bf16 1061961548, %v1062_v40 }
 0x2de   : > { %v1016_v8 = vmul.bf16 %v990_v29, %v2928_v24  ;;  %v991_v42 = vmul.bf16 %v2935_v30, %v2935_v30  ;;  %v1064_v29 = vadd.bf16 %v1038_v4, %v2896_v27  ;;  %v898_v35 = vadd.f32 %v897_v6, %v2847_v25 }
 0x2df   : > { %v899_v19 = vpop.f32.mrf.mxu0  ;;  %v1087_v4 = vmul.bf16 1061961548, %v1061_v17  ;;  %1846 = vtanh.bf16 %v1086_v57  ;;  %v1006_v57 = vmul.bf16 %v980_v28, %v2860_v2 }
 0x2e0   : > { %v1017_v14 = vmul.bf16 %v991_v42, %v2935_v30  ;;  %v900_v32 = vadd.f32 %v899_v19, %v2843_v3  ;;  %v1042_v38 = vmul.bf16 1027030327, %v1016_v8  ;;  %v1091_v19 = vmul.bf16 1061961548, %v1065_v49 }
 0x2e1   : > { %v901_v37 = vpop.f32.mrf.mxu0  ;;  %1848 = vtanh.bf16 %v1089_v26 }
 0x2e2   : > { %v1043_v7 = vmul.bf16 1027030327, %v1017_v14  ;;  %v2955_v10 = vpack.c.bf16 %v900_v32, %v896_v15  ;;  %v902_v1 = vadd.f32 %v901_v37, %v2847_v25  ;;  %v981_v37 = vmul.bf16 %v2863_v12, %v2863_v12 }
 0x2e3   : > { %v2961_v42 = vpop.f32.mrf.mxu0  ;;  %v1067_v32 = vadd.bf16 %v1041_v34, %v2913_v20  ;;  %v1068_v14 = vadd.bf16 %v1042_v38, %v2928_v24  ;;  %v1090_v15 = vmul.bf16 1061961548, %v1064_v29  ;;  %1850 = vtanh.bf16 %v1091_v19 }
 0x2e4   : > { %v1069_v22 = vadd.bf16 %v1043_v7, %v2935_v30  ;;  %v992_v31 = vmul.bf16 %v2955_v10, %v2955_v10  ;;  %v2966_v6 = vpack.c.bf16 %v902_v1, %v898_v35  ;;  %v1005_v35 = vmul.bf16 %v979_v21, %v2855_v11 }
 0x2e5   : > { %v907_v8 = vpop.f32.mrf.mxu0  ;;  %v1092_v1 = vmul.bf16 1061961548, %v1066_v0  ;;  %1852 = vtanh.bf16 %v1087_v4  ;;  %v1030_v38 = vmul.bf16 1027030327, %v2940_v63  ;;  %v1007_v40 = vmul.bf16 %v981_v37, %v2863_v12 }
 0x2e6   : > { %v1018_v17 = vmul.bf16 %v992_v31, %v2955_v10  ;;  %v993_v49 = vmul.bf16 %v2966_v6, %v2966_v6  ;;  %v1095_v26 = vmul.bf16 1061961548, %v1069_v22  ;;  %v1093_v41 = vmul.bf16 1061961548, %v1067_v32 }
 0x2e7   : > { %v909_v7 = vpop.f32.mrf.mxu0  ;;  %1854 = vtanh.bf16 %v1088_v23  ;;  %v1094_v43 = vmul.bf16 1061961548, %v1068_v14  ;;  %v1031_v28 = vmul.bf16 1027030327, %v1005_v35  ;;  %v1032_v19 = vmul.bf16 1027030327, %v1006_v57 }
 0x2e8   : > { %v1019_v34 = vmul.bf16 %v993_v49, %v2966_v6  ;;  %v1044_v39 = vmul.bf16 1027030327, %v1018_v17  ;;  %1856 = vtanh.bf16 %v1090_v15  ;;  %v1033_v4 = vmul.bf16 1027030327, %v1007_v40 }
 0x2e9   : > { %v911_v31 = vpop.f32.mrf.mxu0  ;;  %1858 = vtanh.bf16 %v1092_v1  ;;  %v1056_v37 = vadd.bf16 %v1030_v38, %v2852_v16  ;;  %v1057_v23 = vadd.bf16 %v1031_v28, %v2855_v11  ;;  %v1058_v14 = vadd.bf16 %v1032_v19, %v2860_v2 }
 0x2ea   : > { %v1045_v29 = vmul.bf16 1027030327, %v1019_v34  ;;  %v1070_v21 = vadd.bf16 %v1044_v39, %v2955_v10  ;;  %1860 = vtanh.bf16 %v1095_v26  ;;  %v1059_v49 = vadd.bf16 %v1033_v4, %v2863_v12 }
 0x2eb   : > { %v915_v0 = vpop.f32.mrf.mxu0  ;;  %1862 = vtanh.bf16 %v1093_v41  ;;  %v1082_v57 = vmul.bf16 1061961548, %v1056_v37  ;;  %v1083_v41 = vmul.bf16 1061961548, %v1057_v23  ;;  %v1084_v26 = vmul.bf16 1061961548, %v1058_v14 }
 0x2ec   : > { %v1071_v17 = vadd.bf16 %v1045_v29, %v2966_v6  ;;  %v1096_v63 = vmul.bf16 1061961548, %v1070_v21  ;;  %1864 = vtanh.bf16 %v1094_v43  ;;  %v1085_v43 = vmul.bf16 1061961548, %v1059_v49 }
 0x2ed   : > { %v917_v22 = vpop.f32.mrf.mxu0  ;;  %v2986_v35 = vpop.eup %1846  ;;  %v912_v21 = vadd.f32 %v911_v31, %v2847_v25  ;;  %v910_v37 = vadd.f32 %v909_v7, %v2843_v3 }
 0x2ee   : > { %v1097_v32 = vmul.bf16 1061961548, %v1071_v17  ;;  %1866 = vtanh.bf16 %v1096_v63  ;;  %v908_v63 = vadd.f32 %v907_v8, %v2847_v25 }
 0x2ef   : > { %v919_v39 = vpop.f32.mrf.mxu0  ;;  %v1849_v1 = vpop.eup %1848 }
 0x2f0   : > { %1868 = vtanh.bf16 %v1097_v32  ;;  %v1141_v17 = vadd.bf16 1065369472, %v1849_v1  ;;  %v906_v1 = vadd.f32 %v2961_v42, %v2843_v3 }
 0x2f1   : > { %v921_v15 = vpop.f32.mrf.mxu0  ;;  %v1851_v38 = vpop.eup %1850  ;;  %1870 = vtanh.bf16 %v1082_v57 }
 0x2f2   : > { %1872 = vtanh.bf16 %v1083_v41  ;;  %v1143_v32 = vadd.bf16 1065369472, %v1851_v38  ;;  %v3003_v41 = vpack.c.bf16 %v912_v21, %v908_v63  ;;  %v3009_v49 = vmul.bf16 1056980736, %v1141_v17 }
 0x2f3   : > { %v925_v34 = vpop.f32.mrf.mxu0  ;;  %v2988_v29 = vpop.eup %1852  ;;  %1874 = vtanh.bf16 %v1084_v26  ;;  %v922_v26 = vadd.f32 %v921_v15, %v2847_v25  ;;  %v3012_v46 = vpack.c.bf16 %v910_v37, %v906_v1  ;;  %v918_v15 = vadd.f32 %v917_v22, %v2847_v25 }
 0x2f4   : > { %1876 = vtanh.bf16 %v1085_v43  ;;  %v3016_v21 = vmul.bf16 1056980736, %v1143_v32  ;;  %v995_v37 = vmul.bf16 %v3003_v41, %v3003_v41  ;;  %v920_v1 = vadd.f32 %v919_v39, %v2843_v3 }
 0x2f5   : > { %v927_v40 = vpop.f32.mrf.mxu0  ;;  %v2991_v28 = vpop.eup %1854 }
 0x2f6   : > { %v2993_v4 = vpop.eup %1856  ;;  %v928_v8 = vadd.f32 %v927_v40, %v2847_v25 }
 0x2f7   : > { %v929_v19 = vpop.f32.mrf.mxu0  ;;  %v2997_v23 = vpop.eup %1858 }
 0x2f8   : > { %v1861_v57 = vpop.eup %1860  ;;  %v930_v44 = vadd.f32 %v929_v19, %v2843_v3  ;;  %v926_v19 = vadd.f32 %v925_v34, %v2843_v3 }
 0x2f9   : > { %v931_v14 = vpop.f32.mrf.mxu0  ;;  %v1863_v38 = vpop.eup %1862  ;;  %v1147_v47 = vadd.bf16 1065369472, %v1861_v57 }
 0x2fa   : > { %v932_v7 = vadd.f32 %v931_v14, %v2847_v25  ;;  %v1865_v31 = vpop.eup %1864  ;;  %v916_v14 = vadd.f32 %v915_v0, %v2843_v3  ;;  %v3029_v43 = vpack.c.bf16 %v930_v44, %v926_v19  ;;  %v1145_v51 = vadd.bf16 1065369472, %v1863_v38 }
 0x2fb   : > { %v935_v45 = vpop.f32.mrf.mxu0  ;;  %v1146_v40 = vadd.bf16 1065369472, %v1865_v31  ;;  %v1173_v54 = vmul.bf16 1056980736, %v1147_v47 }
 0x2fc   : > { %v3014_v42 = vpack.c.bf16 %v932_v7, %v928_v8  ;;  %v1867_v63 = vpop.eup %1866  ;;  %v3027_v7 = vpack.c.bf16 %v922_v26, %v918_v15  ;;  %v936_v34 = vadd.f32 %v935_v45, %v2843_v3  ;;  %v3035_v26 = vpack.c.bf16 %v920_v1, %v916_v14 }
 0x2fd   : > { %v937_v17 = vpop.f32.mrf.mxu0  ;;  %v1148_v8 = vadd.bf16 1065369472, %v1867_v63  ;;  %v1144_v63 = vadd.bf16 1065369472, %v2997_v23  ;;  %v998_v31 = vmul.bf16 %v3029_v43, %v3029_v43  ;;  %v1172_v47 = vmul.bf16 1056980736, %v1146_v40 }
 0x2fe   : > { %v1869_v48 = vpop.eup %1868  ;;  %v999_v32 = vmul.bf16 %v3014_v42, %v3014_v42  ;;  %v938_v44 = vadd.f32 %v937_v17, %v2847_v25  ;;  %v997_v45 = vmul.bf16 %v3027_v7, %v3027_v7 }
 0x2ff   : > { %v939_v0 = vpop.f32.mrf.mxu0  ;;  %v1149_v22 = vadd.bf16 1065369472, %v1869_v48  ;;  %v1174_v50 = vmul.bf16 1056980736, %v1148_v8 }
 0x300   : > { %v940_v57 = vadd.f32 %v939_v0, %v2843_v3  ;;  %v1025_v52 = vmul.bf16 %v999_v32, %v3014_v42  ;;  %v3046_v32 = vpop.eup %1870 }
 0x301   : > { %v941_v39 = vpop.f32.mrf.mxu0  ;;  %v1175_v53 = vmul.bf16 1056980736, %v1149_v22  ;;  %v1200_v1 = vmul.bf16 %v1174_v50, %v2955_v10  ;;  %v3054_v8 = vpop.eup %1872  ;;  %v1198_v10 = vmul.bf16 %v1172_v47, %v2928_v24  ;;  %v1021_v24 = vmul.bf16 %v995_v37, %v3003_v41 }
 0x302   : > { %v3038_v15 = vpack.c.bf16 %v940_v57, %v936_v34  ;;  %v942_v48 = vadd.f32 %v941_v39, %v2847_v25  ;;  %v1051_v0 = vmul.bf16 1027030327, %v1025_v52  ;;  %v1199_v34 = vmul.bf16 %v1173_v54, %v2935_v30  ;;  %v3057_v40 = vpop.eup %1874 }
 0x303   : > { %v945_v38 = vpop.f32.mrf.mxu0  ;;  %v1201_v19 = vmul.bf16 %v1175_v53, %v2966_v6  ;;  %v1171_v53 = vmul.bf16 1056980736, %v1145_v51  ;;  %v1170_v6 = vmul.bf16 1056980736, %v1144_v63  ;;  %v996_v52 = vmul.bf16 %v3035_v26, %v3035_v26 }
 0x304   : > { %v1000_v23 = vmul.bf16 %v3038_v15, %v3038_v15  ;;  %v3050_v14 = vpack.c.bf16 %v942_v48, %v938_v44  ;;  %v946_v17 = vadd.f32 %v945_v38, %v2843_v3  ;;  %v3065_v3 = vpop.eup %1876  ;;  %v1023_v51 = vmul.bf16 %v997_v45, %v3027_v7 }
 0x305   : > { %v947_v22 = vpop.f32.mrf.mxu0  ;;  %1223 = vmatprep.subr.bf16.mxu1 %v1201_v19  ;;  %v1024_v54 = vmul.bf16 %v998_v31, %v3029_v43  ;;  %v994_v19 = vmul.bf16 %v3012_v46, %v3012_v46  ;;  %v1197_v31 = vmul.bf16 %v1171_v53, %v2913_v20  ;;  %v1196_v20 = vmul.bf16 %v1170_v6, %v2906_v60 }
 0x306   : > { %v1026_v57 = vmul.bf16 %v1000_v23, %v3038_v15  ;;  %v1001_v39 = vmul.bf16 %v3050_v14, %v3050_v14  ;;  %v3062_v44 = vpack.c.bf16 %v946_v17, %v946_v17  ;;  %v948_v50 = vadd.f32 %v947_v22, %v2847_v25  ;;  %1224 = vmatpush1.bf16.msra.mxu1 %v1200_v1 }
 0x307   : > { %v949_v30 = vpop.f32.mrf.mxu0  ;;  %1225 = vmatprep.subr.bf16.mxu1 %v1199_v34  ;;  %v1077_v23 = vadd.bf16 %v1051_v0, %v3014_v42  ;;  %v3543_v17 = vadd.bf16 1065369472, %v2993_v4  ;;  %v1049_v53 = vmul.bf16 1027030327, %v1023_v51  ;;  %v1047_v51 = vmul.bf16 1027030327, %v1021_v24 }
 0x308   : > { %v1052_v63 = vmul.bf16 1027030327, %v1026_v57  ;;  %v1027_v48 = vmul.bf16 %v1001_v39, %v3050_v14  ;;  %v1002_v25 = vmul.bf16 %v3062_v44, %v3062_v44  ;;  %v3075_v38 = vpack.c.bf16 %v948_v50, %v948_v50 }
 0x309   : > { %v950_v45 = vpop.f32.mrf.mxu0  ;;  %v1168_v1 = vmul.bf16 1056980736, %v3543_v17  ;;  %v1022_v57 = vmul.bf16 %v996_v52, %v3035_v26  ;;  %v1050_v39 = vmul.bf16 1027030327, %v1024_v54  ;;  %v1195_v30 = vmul.bf16 %v3016_v21, %v2889_v18 }
 0x30a   : > { %v1053_v47 = vmul.bf16 1027030327, %v1027_v48  ;;  %v1028_v22 = vmul.bf16 %v1002_v25, %v3062_v44  ;;  %v1003_v34 = vmul.bf16 %v3075_v38, %v3075_v38  ;;  %1226 = vmatpush1.bf16.msra.mxu1 %v1198_v10  ;;  %v1078_v0 = vadd.bf16 %v1052_v63, %v3038_v15 }
 0x30b   : > { %1227 = vmatprep.subr.bf16.mxu1 %v1197_v31  ;;  %v1194_v48 = vmul.bf16 %v1168_v1, %v2896_v27  ;;  %v3544_v10 = vadd.bf16 1065369472, %v2991_v28  ;;  %v1103_v54 = vmul.bf16 1061961548, %v1077_v23  ;;  %v1020_v63 = vmul.bf16 %v994_v19, %v3012_v46 }
 0x30c   : > { %v1079_v4 = vadd.bf16 %v1053_v47, %v3050_v14  ;;  %v1054_v50 = vmul.bf16 1027030327, %v1028_v22  ;;  %v1029_v37 = vmul.bf16 %v1003_v34, %v3075_v38  ;;  %v1048_v45 = vmul.bf16 1027030327, %v1022_v57 }
 0x30d   : > { %v1166_v52 = vmul.bf16 1056980736, %v3544_v10  ;;  %v1076_v31 = vadd.bf16 %v1050_v39, %v3029_v43  ;;  %v1104_v17 = vmul.bf16 1061961548, %v1078_v0  ;;  %v1075_v18 = vadd.bf16 %v1049_v53, %v3027_v7 }
 0x30e   : > { %v1080_v25 = vadd.bf16 %v1054_v50, %v3062_v44  ;;  %v1055_v60 = vmul.bf16 1027030327, %v1029_v37  ;;  %1228 = vmatpush1.bf16.msra.mxu1 %v1196_v20  ;;  %v1105_v6 = vmul.bf16 1061961548, %v1079_v4  ;;  %v1193_v21 = vmul.bf16 %v3009_v49, %v2879_v13 }
 0x30f   : > { %1229 = vmatprep.subr.bf16.mxu1 %v1195_v30  ;;  %v3545_v19 = vadd.bf16 1065369472, %v2988_v29  ;;  %v1137_v1 = vadd.bf16 1065369472, %v3065_v3  ;;  %v3546_v47 = vadd.bf16 1065369472, %v2986_v35  ;;  %v1074_v39 = vadd.bf16 %v1048_v45, %v3035_v26 }
 0x310   : > { %v1106_v27 = vmul.bf16 1061961548, %v1080_v25  ;;  %v1081_v28 = vadd.bf16 %v1055_v60, %v3075_v38  ;;  %1878 = vtanh.bf16 %v1105_v6  ;;  %v1136_v34 = vadd.bf16 1065369472, %v3057_v40 }
 0x311   : > { %v1165_v23 = vmul.bf16 1056980736, %v3545_v19  ;;  %1880 = vtanh.bf16 %v1103_v54  ;;  %v1164_v22 = vmul.bf16 1056980736, %v3546_v47  ;;  %v1046_v57 = vmul.bf16 1027030327, %v1020_v63 }
 0x312   : > { %v1107_v24 = vmul.bf16 1061961548, %v1081_v28  ;;  %1230 = vmatpush1.bf16.msra.mxu1 %v1194_v48  ;;  %1882 = vtanh.bf16 %v1106_v27  ;;  %v1102_v13 = vmul.bf16 1061961548, %v1076_v31  ;;  %v1073_v29 = vadd.bf16 %v1047_v51, %v3003_v41 }
 0x313   : > { %1231 = vmatprep.subr.bf16.mxu1 %v1193_v21  ;;  %1884 = vtanh.bf16 %v1104_v17  ;;  %v1192_v49 = vmul.bf16 %v1166_v52, %v2891_v36  ;;  %v1101_v3 = vmul.bf16 1061961548, %v1075_v18  ;;  %v1191_v0 = vmul.bf16 %v1165_v23, %v2886_v9 }
 0x314   : > { %1886 = vtanh.bf16 %v1107_v24  ;;  %v1163_v20 = vmul.bf16 1056980736, %v1137_v1  ;;  %v1135_v35 = vadd.bf16 1065369472, %v3054_v8  ;;  %v1072_v40 = vadd.bf16 %v1046_v57, %v3012_v46 }
 0x315   : > { %v1134_v53 = vadd.bf16 1065369472, %v3046_v32  ;;  %1888 = vtanh.bf16 %v1102_v13  ;;  %v1100_v4 = vmul.bf16 1061961548, %v1074_v39  ;;  %v1190_v50 = vmul.bf16 %v1164_v22, %v2867_v5 }
 0x316   : > { %1232 = vmatpush1.bf16.msra.mxu1 %v1192_v49  ;;  %v1162_v37 = vmul.bf16 1056980736, %v1136_v34  ;;  %1890 = vtanh.bf16 %v1101_v3  ;;  %v1099_v30 = vmul.bf16 1061961548, %v1073_v29  ;;  %v1189_v36 = vmul.bf16 %v1163_v20, %v2863_v12 }
 0x317   : > { %1233 = vmatprep.subr.bf16.mxu1 %v1191_v0  ;;  %v1161_v48 = vmul.bf16 1056980736, %v1135_v35  ;;  %1892 = vtanh.bf16 %v1100_v4  ;;  %v1098_v9 = vmul.bf16 1061961548, %v1072_v40  ;;  %v1160_v10 = vmul.bf16 1056980736, %v1134_v53 }
 0x318   : > { %v1188_v8 = vmul.bf16 %v1162_v37, %v2860_v2  ;;  %1894 = vtanh.bf16 %v1099_v30  ;;  %v1803_v4 = vld [vmem:[%s2725_s24 + $0x64] ss:$8 sps:$4 sm:$0xff]   ;;  %v1806_v37 = vld [vmem:[%s2725_s24 + $0x54] ss:$8 sps:$4 sm:$0xff]   ;;  %v1804_v30 = vld [vmem:[%s2725_s24 + $0x50] ss:$8 sps:$4 sm:$0xff]  }
 0x319   : > { %v1187_v32 = vmul.bf16 %v1161_v48, %v2855_v11  ;;  %1896 = vtanh.bf16 %v1098_v9  ;;  %v1186_v63 = vmul.bf16 %v1160_v10, %v2852_v16  ;;  %v1812_v48 = vld [vmem:[%s2725_s24 + $0x34] ss:$8 sps:$4 sm:$0xff]   ;;  %v1810_v9 = vld [vmem:[%s2725_s24 + $0x30] ss:$8 sps:$4 sm:$0xff]   ;;  %v1813_v10 = vld [vmem:[%s2725_s24 + $0x20] ss:$8 sps:$4 sm:$0xff]  }
 0x31a   : > { %1234 = vmatpush1.bf16.msra.mxu1 %v1190_v50  ;;  %v3547_v50 = vld [vmem:[#allocation15_spill] sm:$0xff] }
 0x31b   : > { %1235 = vmatprep.subr.bf16.mxu1 %v1189_v36  ;;  %v1807_v36 = vld [vmem:[%s2725_s24 + $0x40] ss:$8 sps:$4 sm:$0xff]  }
 0x31e   : > { %v1879_v52 = vpop.eup %1878  ;;  %1236 = vmatpush1.bf16.msra.mxu1 %v1188_v8  ;;  %v1815_v8 = vld [vmem:[%s2725_s24 + $0x24] ss:$8 sps:$4 sm:$0xff]  }
 0x31f   : > { %v1881_v54 = vpop.eup %1880  ;;  %1237 = vmatprep.subr.bf16.mxu1 %v1187_v32  ;;  %v1157_v60 = vadd.bf16 1065369472, %v1879_v52  ;;  %v1818_v32 = vld [vmem:[%s2725_s24 + $0x14] ss:$8 sps:$4 sm:$0xff]   ;;  %v1816_v52 = vld [vmem:[%s2725_s24 + $0x10] ss:$8 sps:$4 sm:$0xff]  }
 0x320   : > { %v1883_v5 = vpop.eup %1882  ;;  %v1155_v27 = vadd.bf16 1065369472, %v1881_v54  ;;  %v1821_v54 = vld [vmem:[%s2725_s24 + $0x4] ss:$8 sps:$4 sm:$0xff]  }
 0x321   : > { %v1885_v12 = vpop.eup %1884  ;;  %v1158_v25 = vadd.bf16 1065369472, %v1883_v5  ;;  %v1183_v18 = vmul.bf16 1056980736, %v1157_v60  ;;  %v1819_v5 = vld [vmem:[%s2725_s24] ss:$8 sps:$4 sm:$0xff]  }
 0x322   : > { %v1887_v6 = vpop.eup %1886  ;;  %1238 = vmatpush1.bf16.msra.mxu1 %v1186_v63  ;;  %v1156_v2 = vadd.bf16 1065369472, %v1885_v12  ;;  %v1181_v47 = vmul.bf16 1056980736, %v1155_v27  ;;  %v1824_v63 = vld [vmem:[%s2725_s24 + $0xf4] ss:$8 sps:$4 sm:$0xff]  }
 0x323   : > { %v1159_v51 = vadd.bf16 1065369472, %v1887_v6  ;;  %v1184_v45 = vmul.bf16 1056980736, %v1158_v25  ;;  %v1889_v31 = vpop.eup %1888  ;;  %v1209_v24 = vmul.bf16 %v1183_v18, %v3050_v14  ;;  %v1822_v12 = vld [vmem:[%s2725_s24 + $0xf0] ss:$8 sps:$4 sm:$0xff]  }
 0x324   : > { %v1891_v28 = vpop.eup %1890  ;;  %v1182_v19 = vmul.bf16 1056980736, %v1156_v2  ;;  %v1154_v16 = vadd.bf16 1065369472, %v1889_v31  ;;  %v1207_v29 = vmul.bf16 %v1181_v47, %v3014_v42  ;;  %v1827_v25 = vld [vmem:[%s2725_s24 + $0xe4] ss:$8 sps:$4 sm:$0xff]  }
 0x325   : > { %v1185_v17 = vmul.bf16 1056980736, %v1159_v51  ;;  %v1210_v11 = vmul.bf16 %v1184_v45, %v3062_v44  ;;  %v1893_v23 = vpop.eup %1892  ;;  %v1153_v22 = vadd.bf16 1065369472, %v1891_v28  ;;  %v1825_v60 = vld [vmem:[%s2725_s24 + $0xe0] ss:$8 sps:$4 sm:$0xff]  }
 0x326   : > { %v1895_v34 = vpop.eup %1894  ;;  %v1208_v44 = vmul.bf16 %v1182_v19, %v3038_v15  ;;  %v1180_v57 = vmul.bf16 1056980736, %v1154_v16  ;;  %v1152_v39 = vadd.bf16 1065369472, %v1893_v23  ;;  %v1830_v6 = vld [vmem:[%s2725_s24 + $0xd4] ss:$8 sps:$4 sm:$0xff]  }
 0x327   : > { %v1211_v21 = vmul.bf16 %v1185_v17, %v3075_v38  ;;  %v1218_v1 = vsel %vm1216_vm1, %v1210_v11, 0  ;;  %v1897_v13 = vpop.eup %1896  ;;  %v1179_v38 = vmul.bf16 1056980736, %v1153_v22  ;;  %v1151_v49 = vadd.bf16 1065369472, %v1895_v34 }
 0x328   : > { %v1206_v14 = vmul.bf16 %v1180_v57, %v3029_v43  ;;  %v1178_v3 = vmul.bf16 1056980736, %v1152_v39  ;;  %v1150_v0 = vadd.bf16 1065369472, %v1897_v13  ;;  %v1800_v43 = vld [vmem:[%s2725_s24 + $0x74] ss:$8 sps:$4 sm:$0xff]  }
 0x329   : > { %1674 = vmatprep.subr.msk.bf16.mxu1 %vm1216_vm1, %v1211_v21  ;;  %v1205_v20 = vmul.bf16 %v1179_v38, %v3027_v7  ;;  %v1177_v35 = vmul.bf16 1056980736, %v1151_v49  ;;  %v1798_v7 = vld [vmem:[%s2725_s24 + $0x70] ss:$8 sps:$4 sm:$0xff]   ;;  %v1833_v45 = vld [vmem:[%s2725_s24 + $0xc4] ss:$8 sps:$4 sm:$0xff]  }
 0x32a   : > { %1246 = vmatpush2.bf16.msra.mxu1 %v1218_v1  ;;  %v1204_v42 = vmul.bf16 %v1178_v3, %v3035_v26  ;;  %v1176_v15 = vmul.bf16 1056980736, %v1150_v0  ;;  %v3548_v26 = vpack.c.bf16 %v3547_v50, %v3547_v50  ;;  %v1828_v51 = vld [vmem:[%s2725_s24 + $0xd0] ss:$8 sps:$4 sm:$0xff]   ;;  %v1831_v2 = vld [vmem:[%s2725_s24 + $0xc0] ss:$8 sps:$4 sm:$0xff]  }
 0x32b   : > { %1247 = vmatprep.subr.bf16.mxu1 %v1209_v24  ;;  %v1203_v40 = vmul.bf16 %v1177_v35, %v3003_v41  ;;  %v1801_v41 = vld [vmem:[%s2725_s24 + $0x60] ss:$8 sps:$4 sm:$0xff]   ;;  %v1836_v31 = vld [vmem:[%s2725_s24 + $0xb4] ss:$8 sps:$4 sm:$0xff]   ;;  %v1834_v17 = vld [vmem:[%s2725_s24 + $0xb0] ss:$8 sps:$4 sm:$0xff]  }
 0x32c   : > { %v1202_v53 = vmul.bf16 %v1176_v15, %v3012_v46  ;;  %v1809_v46 = vld [vmem:[%s2725_s24 + $0x44] ss:$8 sps:$4 sm:$0xff]   ;;  %v1837_v18 = vld [vmem:[%s2725_s24 + $0xa0] ss:$8 sps:$4 sm:$0xff]   ;;  %v1842_v27 = vld [vmem:[%s2725_s24 + $0x94] ss:$8 sps:$4 sm:$0xff]  }
 0x32d   : > { %v1839_v11 = vld [vmem:[%s2725_s24 + $0xa4] ss:$8 sps:$4 sm:$0xff]   ;;  %v1840_v28 = vld [vmem:[%s2725_s24 + $0x90] ss:$8 sps:$4 sm:$0xff]   ;;  %v1843_v19 = vld [vmem:[%s2725_s24 + $0x80] ss:$8 sps:$4 sm:$0xff]  }
 0x32e   : > { %1248 = vmatpush2.bf16.msra.mxu1 %v1208_v44  ;;  %v1845_v21 = vld [vmem:[%s2725_s24 + $0x84] ss:$8 sps:$4 sm:$0xff]   ;;  %v3551_v13 = vld [vmem:[#allocation111_spill] sm:$0xff]  ;;  %v3556_v3 = vld [vmem:[#allocation18_spill] sm:$0xff] (%p575_p6) }
 0x32f   : > { %1249 = vmatprep.subr.bf16.mxu1 %v1207_v29  ;;  %v3549_v44 = vld [vmem:[#allocation112_spill] sm:$0xff]  ;;  %1710 = vmatprep.mubr.msk.f32.mxu0 (%p575_p6), %vm1212_vm0, %v3556_v3  ;;  %v3557_v0 = vld [vmem:[#allocation47_spill] sm:$0xff] (%p575_p6)  ;;  %v3559_v35 = vld [vmem:[#allocation45_spill] sm:$0xff] (%p575_p6) }
 0x330   :  { %v3561_v15 = vld [vmem:[#allocation43_spill] sm:$0xff] (%p575_p6) }
 0x331   :  { %v3573_v50 = vld [vmem:[#allocation31_spill] sm:$0xff] (%p575_p6) }
 0x332   : > { %1250 = vmatpush2.bf16.msra.mxu1 %v1206_v14  ;;  %v3555_v14 = vld [vmem:[#allocation48_spill] sm:$0xff] (%p575_p6) }
 0x333   : > { %1251 = vmatprep.subr.bf16.mxu1 %v1205_v20  ;;  %1509 = vmatprep.subr.mxu0 (%p575_p6), %v3555_v14  ;;  %v3558_v20 = vld [vmem:[#allocation46_spill] sm:$0xff] (%p575_p6) }
 0x334   :  { %1510 = vmatpush1.msra.mxu0 (%p575_p6), %v3557_v0 }
 0x335   :  { %1511 = vmatprep.subr.mxu0 (%p575_p6), %v3558_v20 }
 0x336   : > { %1252 = vmatpush2.bf16.msra.mxu1 %v1204_v42  ;;  %1512 = vmatpush1.msra.mxu0 (%p575_p6), %v3559_v35  ;;  %v3560_v42 = vld [vmem:[#allocation44_spill] sm:$0xff] (%p575_p6) }
 0x337   : > { %1253 = vmatprep.subr.bf16.mxu1 %v1203_v40  ;;  %1513 = vmatprep.subr.mxu0 (%p575_p6), %v3560_v42  ;;  %v3562_v40 = vld [vmem:[#allocation42_spill] sm:$0xff] (%p575_p6) }
 0x338   :  { %1514 = vmatpush1.msra.mxu0 (%p575_p6), %v3561_v15 }
 0x339   :  { %1515 = vmatprep.subr.mxu0 (%p575_p6), %v3562_v40 }
 0x33a   : > { %1254 = vmatpush2.bf16.msra.mxu1 %v1202_v53  ;;  %v3564_v53 = vld [vmem:[#allocation40_spill] sm:$0xff] (%p575_p6) }
 0x33b   : > { %1463 = vmatprep.subr.bf16.mxu1 %v1800_v43  ;;  %v3563_v43 = vld [vmem:[#allocation41_spill] sm:$0xff] (%p575_p6) }
 0x33c   :  { %1516 = vmatpush1.msra.mxu0 (%p575_p6), %v3563_v43 }
 0x33d   : > { %1256 = vmatmul.mubr.bf16.vlgmr.msra.gmra.mxu1 %v3548_v26  ;;  %1517 = vmatprep.subr.mxu0 (%p575_p6), %v3564_v53  ;;  %v3574_v26 = vld [vmem:[#allocation30_spill] sm:$0xff] (%p575_p6) }
 0x33e   : > { %1464 = vmatpush1.bf16.msra.mxu1 %v1798_v7  ;;  %1518 = vmatpush1.msra.mxu0 (%p575_p6), %v3565_v59  ;;  %v3571_v7 = vld [vmem:[#allocation33_spill] sm:$0xff] (%p575_p6) }
 0x33f   : > { %1465 = vmatprep.subr.bf16.mxu1 %v1803_v4  ;;  %1519 = vmatprep.subr.mxu0 (%p575_p6), %v3566_v55  ;;  %v3572_v4 = vld [vmem:[#allocation32_spill] sm:$0xff] (%p575_p6) }
 0x340   :  { %1520 = vmatpush1.msra.mxu0 (%p575_p6), %v3567_v61 }
 0x341   :  { %1521 = vmatprep.subr.mxu0 (%p575_p6), %v3568_v62 }
 0x342   : > { %1466 = vmatpush1.bf16.msra.mxu1 %v1801_v41  ;;  %1522 = vmatpush1.msra.mxu0 (%p575_p6), %v3569_v58  ;;  %v3575_v41 = vld [vmem:[#allocation29_spill] sm:$0xff] (%p575_p6) }
 0x343   : > { %1467 = vmatprep.subr.bf16.mxu1 %v1806_v37  ;;  %1523 = vmatprep.subr.mxu0 (%p575_p6), %v3570_v56  ;;  %v3576_v37 = vld [vmem:[#allocation28_spill] sm:$0xff] (%p575_p6) }
 0x344   :  { %1524 = vmatpush1.msra.mxu0 (%p575_p6), %v3571_v7 }
 0x345   :  { %1525 = vmatprep.subr.mxu0 (%p575_p6), %v3572_v4 }
 0x346   : > { %1468 = vmatpush1.bf16.msra.mxu1 %v1804_v30  ;;  %1526 = vmatpush1.msra.mxu0 (%p575_p6), %v3573_v50  ;;  %v3577_v30 = vld [vmem:[#allocation27_spill] sm:$0xff] (%p575_p6) }
 0x347   : > { %1469 = vmatprep.subr.bf16.mxu1 %v1809_v46  ;;  %1527 = vmatprep.subr.mxu0 (%p575_p6), %v3574_v26  ;;  %v3578_v46 = vld [vmem:[#allocation26_spill] sm:$0xff] (%p575_p6) }
 0x348   :  { %1528 = vmatpush1.msra.mxu0 (%p575_p6), %v3575_v41 }
 0x349   :  { %1529 = vmatprep.subr.mxu0 (%p575_p6), %v3576_v37 }
 0x34a   : > { %1470 = vmatpush1.bf16.msra.mxu1 %v1807_v36  ;;  %1530 = vmatpush1.msra.mxu0 (%p575_p6), %v3577_v30  ;;  %v3579_v36 = vld [vmem:[#allocation25_spill] sm:$0xff] (%p575_p6) }
 0x34b   : > { %1471 = vmatprep.subr.bf16.mxu1 %v1812_v48  ;;  %1531 = vmatprep.subr.mxu0 (%p575_p6), %v3578_v46  ;;  %v3580_v48 = vld [vmem:[#allocation24_spill] sm:$0xff] (%p575_p6) }
 0x34c   :  { %1532 = vmatpush1.msra.mxu0 (%p575_p6), %v3579_v36 }
 0x34d   :  { %1533 = vmatprep.subr.mxu0 (%p575_p6), %v3580_v48 }
 0x34e   : > { %1472 = vmatpush1.bf16.msra.mxu1 %v1810_v9  ;;  %v3581_v9 = vld [vmem:[#allocation23_spill] sm:$0xff] (%p575_p6) }
 0x34f   : > { %1473 = vmatprep.subr.bf16.mxu1 %v1815_v8  ;;  %1534 = vmatpush1.msra.mxu0 (%p575_p6), %v3581_v9  ;;  %v3582_v8 = vld [vmem:[#allocation20_spill] sm:$0xff] (%p575_p6) }
 0x350   :  { %1535 = vmatprep.subr.mxu0 (%p575_p6), %v3582_v8 }
 0x352   : > { %1474 = vmatpush1.bf16.msra.mxu1 %v1813_v10  ;;  %v3583_v10 = vld [vmem:[#allocation19_spill] sm:$0xff] (%p575_p6) }
 0x353   : > { %1475 = vmatprep.subr.bf16.mxu1 %v1818_v32  ;;  %1536 = vmatpush1.msra.mxu0 (%p575_p6), %v3583_v10  ;;  %v3584_v32 = vld [vmem:[#allocation22_spill] sm:$0xff] (%p575_p6) }
 0x354   :  { %1537 = vmatprep.subr.mxu0 (%p575_p6), %v3584_v32 }
 0x356   : > { %1476 = vmatpush1.bf16.msra.mxu1 %v1816_v52  ;;  %v3585_v52 = vld [vmem:[#allocation21_spill] sm:$0xff] (%p575_p6) }
 0x357   : > { %1477 = vmatprep.subr.bf16.mxu1 %v1821_v54  ;;  %1538 = vmatpush1.msra.mxu0 (%p575_p6), %v3585_v52  ;;  %v3586_v54 = vld [vmem:[#allocation17_spill] sm:$0xff] (%p575_p6) }
 0x358   :  { %1539 = vmatprep.subr.mxu0 (%p575_p6), %v3586_v54 }
 0x35a   : > { %1478 = vmatpush1.bf16.msra.mxu1 %v1819_v5  ;;  %v3587_v5 = vld [vmem:[#allocation16_spill] sm:$0xff] (%p575_p6) }
 0x35b   : > { %1479 = vmatprep.subr.bf16.mxu1 %v1824_v63  ;;  %1540 = vmatpush1.msra.mxu0 (%p575_p6), %v3587_v5  ;;  %v3588_v63 = vld [vmem:[#allocation66_spill] sm:$0xff] (%p575_p6) }
 0x35c   :  { %1555 = vmatprep.subr.mxu0 (%p575_p6), %v3588_v63 }
 0x35e   : > { %1480 = vmatpush2.bf16.msra.mxu1 %v1822_v12 }
 0x35f   : > { %1481 = vmatprep.subr.bf16.mxu1 %v1827_v25  ;;  %v3590_v25 = vld [vmem:[#allocation64_spill] sm:$0xff] (%p575_p6) }
 0x362   : > { %1482 = vmatpush2.bf16.msra.mxu1 %v1825_v60  ;;  %v3591_v60 = vld [vmem:[#allocation63_spill] sm:$0xff] (%p575_p6) }
 0x363   : > { %1483 = vmatprep.subr.bf16.mxu1 %v1830_v6  ;;  %v3592_v6 = vld [vmem:[#allocation62_spill] sm:$0xff] (%p575_p6) }
 0x366   : > { %1484 = vmatpush2.bf16.msra.mxu1 %v1828_v51  ;;  %v3593_v51 = vld [vmem:[#allocation61_spill] sm:$0xff] (%p575_p6) }
 0x367   : > { %1485 = vmatprep.subr.bf16.mxu1 %v1833_v45  ;;  %v3594_v45 = vld [vmem:[#allocation60_spill] sm:$0xff] (%p575_p6) }
 0x36a   : > { %1486 = vmatpush2.bf16.msra.mxu1 %v1831_v2  ;;  %v3595_v2 = vld [vmem:[#allocation59_spill] sm:$0xff] (%p575_p6) }
 0x36b   : > { %1487 = vmatprep.subr.bf16.mxu1 %v1836_v31  ;;  %v3596_v31 = vld [vmem:[#allocation58_spill] sm:$0xff] (%p575_p6) }
 0x36e   : > { %1488 = vmatpush2.bf16.msra.mxu1 %v1834_v17  ;;  %v3597_v17 = vld [vmem:[#allocation57_spill] sm:$0xff] (%p575_p6) }
 0x36f   : > { %1489 = vmatprep.subr.bf16.mxu1 %v1839_v11  ;;  %v3598_v11 = vld [vmem:[#allocation56_spill] sm:$0xff] (%p575_p6) }
 0x372   : > { %1490 = vmatpush2.bf16.msra.mxu1 %v1837_v18  ;;  %v3599_v18 = vld [vmem:[#allocation55_spill] sm:$0xff] (%p575_p6) }
 0x373   : > { %1491 = vmatprep.subr.bf16.mxu1 %v1842_v27  ;;  %v3600_v27 = vld [vmem:[#allocation54_spill] sm:$0xff] (%p575_p6) }
 0x376   : > { %1492 = vmatpush2.bf16.msra.mxu1 %v1840_v28  ;;  %v3601_v28 = vld [vmem:[#allocation53_spill] sm:$0xff] (%p575_p6) }
 0x377   : > { %1493 = vmatprep.subr.bf16.mxu1 %v1845_v21  ;;  %v3602_v21 = vld [vmem:[#allocation52_spill] sm:$0xff] (%p575_p6) }
 0x37a   : > { %1494 = vmatpush2.bf16.msra.mxu1 %v1843_v19  ;;  %v3603_v19 = vld [vmem:[#allocation51_spill] sm:$0xff] (%p575_p6) }
 0x3fd   : > { %v1257_v16 = vpop.f32.mrf.mxu1 }
 0x3fe   : > { %v1301_v24 = vpack.c.bf16 %v1257_v16, %v1257_v16  ;;  %v3604_v16 = vld [vmem:[#allocation50_spill] sm:$0xff] (%p575_p6) }
 0x3ff   : > { %v1259_v23 = vpop.f32.mrf.mxu1 }
 0x400   : > { %v1302_v1 = vpack.c.bf16 %v1259_v23, %v1259_v23  ;;  %v3605_v23 = vld [vmem:[#allocation49_spill] sm:$0xff] (%p575_p6) }
 0x401   : > { %v1261_v47 = vpop.f32.mrf.mxu1 }
 0x402   : > { %1495 = vmatprep.mubr.bf16.mxu1 %v1302_v1  ;;  %v3606_v1 = vld [vmem:[#allocation15_spill] sm:$0xff] (%p575_p6) }
 0x403   : > { %v1262_v22 = vpop.f32.mrf.mxu1  ;;  %1496 = vmatmul.mubr.bf16.vlgmr.msra.gmra.mxu1 %v1301_v24  ;;  %v1580_v24 = vld [vmem:[%s3252_s5] sm:$0x3] (%p575_p6)  ;;  %s1978_s5 = scalar_lea.vmem (%p575_p6), %s1613_s30, 64 }
 0x404   :  { %p1979_p7 = scmp.ne.s32.totalorder (%p575_p6), %s1613_s30, %s1978_s5  ;;  %p1984_p9 = scmp.lt.s32.totalorder (%p575_p6), %s1978_s5, %s1978_s5 }
 0x406   :  { %p1985_p10 = por (%p575_p6), %p1984_p9, %p1983_p8 }
 0x408   :  { %p1986_p11 = pnand (%p575_p6), %p1985_p10, %p1979_p7 }
 0x4c3   : > { %v1497_v34 = vpop.f32.mrf.mxu1 }
 0x4c4   : > { %v3168_v12 = vadd.f32 %v3549_v44, %v1497_v34   ;;  %v3607_v34 = vsub.s32 (%p575_p6), 0, %v2836_v33 }
 0x4c5   : > { %v1499_v57 = vpop.f32.mrf.mxu1  ;;  %577 = sbr.rel (!%p575_p6) target bundleno = 411 (0x19b), region = 70 }
 0x4c6   : > { %v3550_v39 = vmov %v3168_v12  ;;  %v3171_v57 = vadd.f32 %v3551_v13, %v1499_v57   ;;  %v1585_v44 = vrot.slane (%p575_p6), %v1580_v24, %v3607_v34 }
 0x4c7   : > { %v1501_v38 = vpop.f32.mrf.mxu1  ;;  %v3554_v12 = vmov %v3550_v39 }
 0x4c8   : > { %v3552_v29 = vmov %v3171_v57  ;;  %v3589_v12 = vld [vmem:[#allocation65_spill] sm:$0xff] (%p575_p6) }
 0x4c9   : > { %v1502_v49 = vpop.f32.mrf.mxu1  ;;  %v3553_v57 = vmov %v3552_v29  ;;  %1556 = vmatpush2.msra.mxu0 (%p575_p6), %v3589_v12 }
 0x4ca   :  { %1557 = vmatprep.subr.mxu0 %v3590_v25  ;;  %v3608_v57 = vsub.s32 1, %v2836_v33 }
 0x4cb   :  { %1558 = vmatpush2.msra.mxu0 %v3591_v60 }
 0x4cc   :  { %1559 = vmatprep.subr.mxu0 %v3592_v6  ;;  %v1589_v13 = vrot.slane %v1580_v24, %v3608_v57 }
 0x4cd   :  { %1560 = vmatpush2.msra.mxu0 %v3593_v51 }
 0x4ce   :  { %1561 = vmatprep.subr.mxu0 %v3594_v45 }
 0x4cf   :  { %1562 = vmatpush2.msra.mxu0 %v3595_v2 }
 0x4d0   :  { %1563 = vmatprep.subr.mxu0 %v3596_v31 }
 0x4d1   :  { %1564 = vmatpush2.msra.mxu0 %v3597_v17 }
 0x4d2   :  { %1565 = vmatprep.subr.mxu0 %v3598_v11 }
 0x4d3   :  { %1566 = vmatpush2.msra.mxu0 %v3599_v18 }
 0x4d4   :  { %1567 = vmatprep.subr.mxu0 %v3600_v27 }
 0x4d5   :  { %1568 = vmatpush2.msra.mxu0 %v3601_v28 }
 0x4d6   :  { %1569 = vmatprep.subr.mxu0 %v3602_v21 }
 0x4d7   :  { %1570 = vmatpush2.msra.mxu0 %v3603_v19 }
 0x4d8   :  { %1571 = vmatprep.subr.mxu0 %v3604_v16 }
 0x4d9   :  { %1572 = vmatpush2.msra.mxu0 %v3605_v23 }
 0x4da   :  { %1574 = vmatmul.mubr.f32.vlgmr.msra.gmra.mxu0 %v3606_v1 }
 0x59a   :  { %v1575_v47 = vpop.f32.mrf.mxu0 }
 0x59b   :  { %v1576_v22 = vadd.f32 %v1575_v47, %v3550_v39 }
 0x59c   :  { %v1577_v38 = vpop.f32.mrf.mxu0 }
 0x59d   :  { %v1578_v49 = vadd.f32 %v1577_v38, %v3552_v29  ;;  %v1592_v14 = vadd.f32 %v1585_v44, %v1576_v22 }
 0x59f   :  { %v1593_v3 = vadd.f32 %v1589_v13, %v1578_v49 }
 0x5a1   :  { %v1596_v0 = vcombine.low %v1592_v14, %v1593_v3 }
 0x5a3   :  { %1711 = vst.sshfl [vmem:[#allocation10] sm:$0x33 pattern:$0x76325410] %v1596_v0 }
 0x5a4   :  { %1989 = shalt.err (!%p1986_p11)
}
 0x5a5   :  { %1615 = dma.vmem_to_hbm [thread:$0]  %s1613_s30, 64, %s3253_s6, [#allocation4]  }
 0x5a6   :  { %2016 = dma.done.wait [#allocation4], 64  }
 0x5a7   :  { %2017 = vsyncadd [#allocation4], 4294967232 }
 0x5a8   :  { %1619 = vsyncpa [#allocation3], 1 }
 0x5a9   :  { %1620 = vsyncpa [#allocation6], 1 }
 0x5aa   :  { %1621 = vsyncpa [#allocation9], 1 }
 0x5ab   :  { %1622 = vsyncpa [#allocation4], 1 }

</bundles_post_ra>
